<compile_context>
chip_gen: v7x
topology: tpu7x:2x2x1
jax: 0.10.0
libtpu: 0.0.40
codegen_flags: <defaults>
</compile_context>

<pallas_src>
import math
import functools

import jax
import jax.numpy as jnp
import numpy as np
from jax.experimental import pallas as pl
from jax.experimental.pallas import tpu as pltpu


def attention_pool_kernel(x_ref, pos0_ref, poss_ref,
                          wqkv_ref, bqkv_ref, wk_ref, bk_ref, wv_ref, bv_ref,
                          wc_ref, bc_ref, seg_ref, segt_ref,
                          out_ref, *, num_heads):
    # x_ref:    (Bt, S2, C) bf16   spatial tokens of Bt batch elements
    # pos0_ref: (1, C) f32         positional embedding of the mean token
    # poss_ref: (S2, C) f32        positional embedding of the spatial tokens
    # wqkv:     (C, 3C) bf16       fused q|k|v projection (mean token only)
    # wk/wv:    (C, C) bf16        k/v projection for the spatial tokens
    # bqkv:     (1, 3C) f32  bk/bv: (1, C) f32
    # wc:       (C, Co) bf16 bc: (1, Co) f32
    # seg:      (C, H) bf16        sums each head's ch lanes
    # segt:     (H, C) bf16        broadcasts a per-head scalar over its ch lanes
    # out_ref:  (1, Bt*Co)         pooled output, lane-dense store
    bt, s2, c = x_ref.shape
    nh = num_heads
    ch = c // nh
    cout = wc_ref.shape[1]
    inv_sqrt_ch = 1.0 / math.sqrt(ch)          # == scale * scale, folded into q once

    # mean token + positional embedding: f32 accumulation, bf16 toward the MXU
    xf = x_ref[...].astype(jnp.float32)                                   # (Bt,S2,C)
    mean_tok = jnp.sum(xf, axis=1) * (1.0 / s2)                           # (Bt,C)
    tok0 = (mean_tok + pos0_ref[...].astype(jnp.float32)).astype(jnp.bfloat16)
    toks = xf + poss_ref[...].astype(jnp.float32)[None, :, :]
    toks = toks.reshape(bt * s2, c).astype(jnp.bfloat16)                  # (Bt*S2,C)

    # mean-token q/k/v in ONE fused (Bt,C)x(C,3C) MXU pass
    qkv0 = (jnp.dot(tok0, wqkv_ref[...], preferred_element_type=jnp.float32)
            + bqkv_ref[...].astype(jnp.float32))                          # (Bt,3C) f32
    q0 = qkv0[:, 0 * c:1 * c] * inv_sqrt_ch
    k0 = qkv0[:, 1 * c:2 * c]
    v0 = qkv0[:, 2 * c:3 * c]
    q0b = q0.astype(jnp.bfloat16)
    k0b = k0.astype(jnp.bfloat16)

    # spatial-token k/v projections; big intermediates stay bf16 after bias add
    k_sp = (jnp.dot(toks, wk_ref[...], preferred_element_type=jnp.float32)
            + bk_ref[...].astype(jnp.float32)).astype(jnp.bfloat16).reshape(bt, s2, c)
    v_sp = (jnp.dot(toks, wv_ref[...], preferred_element_type=jnp.float32)
            + bv_ref[...].astype(jnp.float32)).astype(jnp.bfloat16).reshape(bt, s2, c)

    seg = seg_ref[...]                                                    # (C,H) bf16
    segt = segt_ref[...]                                                  # (H,C) bf16

    # scores for query token 0 against every key (heads batched, bf16 MXU path)
    prod_sp = k_sp * q0b[:, None, :]                                      # bf16 (Bt,S2,C)
    s_sp = jnp.dot(prod_sp.reshape(bt * s2, c), seg,
                   preferred_element_type=jnp.float32).reshape(bt, s2, nh)
    s0 = jnp.dot(k0b * q0b, seg, preferred_element_type=jnp.float32)      # (Bt,H)

    # softmax over T = S2 + 1 tokens, per batch element and per head (f32 stats)
    m = jnp.maximum(jnp.max(s_sp, axis=1), s0)                            # (Bt,H)
    e0 = jnp.exp(s0 - m)                                                  # (Bt,H)
    e_sp = jnp.exp(s_sp - m[:, None, :])                                  # (Bt,S2,H)
    denom = e0 + jnp.sum(e_sp, axis=1)                                    # (Bt,H)
    inv = pl.reciprocal(denom, approx=True)                               # EUP slot
    w_sp = (e_sp * inv[:, None, :]).astype(jnp.bfloat16)                  # (Bt,S2,H)
    w0 = (e0 * inv).astype(jnp.bfloat16)                                  # (Bt,H)

    # weighted sum of V rows; per-head weight broadcast via bf16 segment matmul
    w_full = jnp.dot(w_sp.reshape(bt * s2, nh), segt,
                     preferred_element_type=jnp.float32).astype(jnp.bfloat16)
    w_full = w_full.reshape(bt, s2, c)                                    # bf16 (Bt,S2,C)
    w0_full = jnp.dot(w0, segt, preferred_element_type=jnp.float32)       # (Bt,C) f32
    a0 = jnp.sum(w_full * v_sp, axis=1, dtype=jnp.float32) + w0_full * v0  # (Bt,C) f32

    # fused c_proj for the pooled token only; lane-dense (1, Bt*Co) store
    out = (jnp.dot(a0.astype(jnp.bfloat16), wc_ref[...],
                   preferred_element_type=jnp.float32)
           + bc_ref[...].astype(jnp.float32))                             # (Bt,Co)
    out_ref[...] = out.reshape(1, bt * cout).astype(out_ref.dtype)


def _pick_block_b(B, max_block_b):
    # largest divisor of B that is <= max_block_b AND keeps nb = B/block_b >= 2
    # (so the parallel batch axis can shard across v7x's 2 TCs / pipeline DMAs).
    for d in range(min(B, max_block_b), 0, -1):
        if B % d == 0 and (B // d >= 2 or B == 1):
            return d
    return 1


def _vmem_limit_bytes(block_b, s2, c, cout, nh):
    bf16, f32 = 2, 4
    t = s2 + 1
    const_b = ((3 * c * c + 2 * c * c + c * cout) * bf16      # wqkv + wk + wv + wc
               + (5 * c + cout + t * c) * f32                 # biases + pos
               + 2 * c * nh * bf16)                           # seg + seg_t
    x_tile = block_b * s2 * c * bf16
    interm = block_b * t * c * (3 * bf16 + 3 * f32)           # live (Bt,T,C)-sized temps
    total = 2 * const_b + 2 * x_tile + interm                 # worst case double buffered
    return max(32 << 20, min(int(1.5 * total) + (2 << 20), 64 << 20))


def attention_pool_2d(x, params, num_heads, max_block_b=8, single_buffer_consts=True):
    """x: [B, C, H, W] (NCHW, matching PyTorch).  Returns [B, Cout]."""
    B, C, H, W = x.shape
    S2 = H * W
    Cout = params["wc"].shape[1]

    block_b = _pick_block_b(B, max_block_b)
    nb = B // block_b

    # glue: NCHW -> [B,S2,C] tokens-major, bf16 (halves the dominant HBM read)
    x_tok = jnp.transpose(x.reshape(B, C, S2), (0, 2, 1)).astype(jnp.bfloat16)
    pos_t = params["pos"].T.astype(jnp.float32)                          # [T,C]
    pos0 = pos_t[0:1, :]
    poss = pos_t[1:, :]

    wqkv_f = params["wqkv"]                                              # (C,3C) f32 master
    wqkv = wqkv_f.astype(jnp.bfloat16)                                   # fused, mean token
    wk = wqkv_f[:, 1 * C:2 * C].astype(jnp.bfloat16)
    wv = wqkv_f[:, 2 * C:3 * C].astype(jnp.bfloat16)
    bqkv_f = params["bqkv"].astype(jnp.float32)
    bqkv = bqkv_f.reshape(1, 3 * C)
    bk = bqkv_f[1 * C:2 * C].reshape(1, C)
    bv = bqkv_f[2 * C:3 * C].reshape(1, C)
    wc = params["wc"].astype(jnp.bfloat16)
    bc = params["bc"].reshape(1, Cout).astype(jnp.float32)

    # per-head segment matrices, hoisted out of the kernel (exact 0/1 in bf16)
    head_of_lane = np.arange(C) // (C // num_heads)
    seg_np = (head_of_lane[:, None] == np.arange(num_heads)[None, :]).astype(np.float32)
    seg = jnp.asarray(seg_np, dtype=jnp.bfloat16)                        # (C,H)
    segt = jnp.asarray(seg_np.T, dtype=jnp.bfloat16)                     # (H,C)

    def const_spec(shape):
        idx = lambda b: (0,) * len(shape)
        if single_buffer_consts:
            # grid-invariant block: no need to double-buffer its VMEM copy
            return pl.BlockSpec(shape, idx, pipeline_mode=pl.Buffered(1))
        return pl.BlockSpec(shape, idx)

    kernel = functools.partial(attention_pool_kernel, num_heads=num_heads)
    out = pl.pallas_call(
        kernel,
        out_shape=jax.ShapeDtypeStruct((nb, 1, block_b * Cout), x.dtype),
        grid=(nb,),
        in_specs=[
            pl.BlockSpec((block_b, S2, C), lambda b: (b, 0, 0)),
            const_spec((1, C)),
            const_spec((S2, C)),
            const_spec((C, 3 * C)),
            const_spec((1, 3 * C)),
            const_spec((C, C)),
            const_spec((1, C)),
            const_spec((C, C)),
            const_spec((1, C)),
            const_spec((C, Cout)),
            const_spec((1, Cout)),
            const_spec((C, num_heads)),
            const_spec((num_heads, C)),
        ],
        out_specs=pl.BlockSpec((None, 1, block_b * Cout), lambda b: (b, 0, 0)),
        compiler_params=pltpu.CompilerParams(
            dimension_semantics=("parallel",),
            vmem_limit_bytes=_vmem_limit_bytes(block_b, S2, C, Cout, num_heads)),
    )(x_tok, pos0, poss, wqkv, bqkv, wk, bk, wv, bv, wc, bc, seg, segt)
    return out.reshape(B, Cout)


def attention_pool_2d_reference(x, params, num_heads):
    """Pure-JAX (f32) replica of the PyTorch forward, for a sanity check."""
    B, C, H, W = x.shape
    T = H * W + 1
    ch = C // num_heads
    xf = x.reshape(B, C, H * W)
    xf = jnp.concatenate([xf.mean(axis=-1, keepdims=True), xf], axis=-1)   # [B,C,T]
    xf = xf + params["pos"][None]
    qkv = jnp.einsum("bct,co->bot", xf, params["wqkv"]) + params["bqkv"][None, :, None]
    q, k, v = jnp.split(qkv, 3, axis=1)
    sh = lambda t: t.reshape(B * num_heads, ch, T)
    scale = 1.0 / math.sqrt(math.sqrt(ch))
    w = jnp.einsum("bct,bcs->bts", sh(q) * scale, sh(k) * scale)
    w = jax.nn.softmax(w.astype(jnp.float32), axis=-1).astype(w.dtype)
    a = jnp.einsum("bts,bcs->bct", w, sh(v)).reshape(B, C, T)
    out = jnp.einsum("bct,co->bot", a, params["wc"]) + params["bc"][None, :, None]
    return out[:, :, 0]


if __name__ == "__main__":
    # module config: spacial_dim=8, embed_dim=32, num_heads_channels=8, output_dim=16
    B, C, H, W = 2, 32, 8, 8
    num_heads_channels = 8
    num_heads = C // num_heads_channels
    Cout = 16
    T = H * W + 1

    key = jax.random.PRNGKey(0)
    k1, k2, k3, k4, k5, kx = jax.random.split(key, 6)
    params = {
        # positional_embedding: randn(embed_dim, spacial_dim**2 + 1) / embed_dim**0.5
        "pos": jax.random.normal(k1, (C, T), jnp.float32) / math.sqrt(C),
        # qkv_proj (Conv1d k=1): torch weight [3C, C, 1] stored transposed as [C, 3C]
        "wqkv": jax.random.normal(k2, (C, 3 * C), jnp.float32) / math.sqrt(C),
        "bqkv": jax.random.normal(k3, (3 * C,), jnp.float32) * 0.01,
        # c_proj (Conv1d k=1): torch weight [Cout, C, 1] stored transposed as [C, Cout]
        "wc": jax.random.normal(k4, (C, Cout), jnp.float32) / math.sqrt(C),
        "bc": jax.random.normal(k5, (Cout,), jnp.float32) * 0.01,
    }
    x = jax.random.normal(kx, (B, C, H, W), jnp.float32)

    run = jax.jit(functools.partial(attention_pool_2d, num_heads=num_heads))
    try:
        out = jax.block_until_ready(run(x, params))
    except Exception:
        # pipeline_mode=pl.Buffered(1) unavailable on this jax build: fall back to
        # plain double-buffered constant blocks (identical results, more VMEM).
        run = jax.jit(functools.partial(attention_pool_2d, num_heads=num_heads,
                                        single_buffer_consts=False))
        out = jax.block_until_ready(run(x, params))

    assert out.shape == (B, Cout) and out.dtype == jnp.float32

    ref = jax.block_until_ready(attention_pool_2d_reference(x, params, num_heads))
    np.testing.assert_allclose(np.asarray(out), np.asarray(ref), rtol=3e-2, atol=3e-2)

    print("KERNEL_OK")
</pallas_src>

<mosaic_0001>
module attributes {stable_mosaic.version = 11 : i64} {
  func.func @attention_pool_kernel(%arg0: i32, %arg1: memref<1x64x32xbf16, #tpu.memory_space<vmem>>, %arg2: memref<1x32xf32, #tpu.memory_space<vmem>>, %arg3: memref<64x32xf32, #tpu.memory_space<vmem>>, %arg4: memref<32x96xbf16, #tpu.memory_space<vmem>>, %arg5: memref<1x96xf32, #tpu.memory_space<vmem>>, %arg6: memref<32x32xbf16, #tpu.memory_space<vmem>>, %arg7: memref<1x32xf32, #tpu.memory_space<vmem>>, %arg8: memref<32x32xbf16, #tpu.memory_space<vmem>>, %arg9: memref<1x32xf32, #tpu.memory_space<vmem>>, %arg10: memref<32x16xbf16, #tpu.memory_space<vmem>>, %arg11: memref<1x16xf32, #tpu.memory_space<vmem>>, %arg12: memref<32x4xbf16, #tpu.memory_space<vmem>>, %arg13: memref<4x32xbf16, #tpu.memory_space<vmem>>, %arg14: memref<1x1x16xf32, #tpu.memory_space<vmem>>) attributes {dimension_semantics = [#tpu.dimension_semantics<parallel>], iteration_bounds = array<i64: 2>, scalar_prefetch = 0 : i64, scratch_operands = 0 : i64, tpu.core_type = #tpu.core_type<tc>, window_params = [{transform_indices = @transform_0, window_bounds = array<i64: 1, 64, 32>}, {pipeline_mode = #tpu.pipeline_mode<synchronous>, transform_indices = @transform_1, window_bounds = array<i64: 1, 32>}, {pipeline_mode = #tpu.pipeline_mode<synchronous>, transform_indices = @transform_2, window_bounds = array<i64: 64, 32>}, {pipeline_mode = #tpu.pipeline_mode<synchronous>, transform_indices = @transform_3, window_bounds = array<i64: 32, 96>}, {pipeline_mode = #tpu.pipeline_mode<synchronous>, transform_indices = @transform_4, window_bounds = array<i64: 1, 96>}, {pipeline_mode = #tpu.pipeline_mode<synchronous>, transform_indices = @transform_5, window_bounds = array<i64: 32, 32>}, {pipeline_mode = #tpu.pipeline_mode<synchronous>, transform_indices = @transform_6, window_bounds = array<i64: 1, 32>}, {pipeline_mode = #tpu.pipeline_mode<synchronous>, transform_indices = @transform_7, window_bounds = array<i64: 32, 32>}, {pipeline_mode = #tpu.pipeline_mode<synchronous>, transform_indices = @transform_8, window_bounds = array<i64: 1, 32>}, {pipeline_mode = #tpu.pipeline_mode<synchronous>, transform_indices = @transform_9, window_bounds = array<i64: 32, 16>}, {pipeline_mode = #tpu.pipeline_mode<synchronous>, transform_indices = @transform_10, window_bounds = array<i64: 1, 16>}, {pipeline_mode = #tpu.pipeline_mode<synchronous>, transform_indices = @transform_11, window_bounds = array<i64: 32, 4>}, {pipeline_mode = #tpu.pipeline_mode<synchronous>, transform_indices = @transform_12, window_bounds = array<i64: 4, 32>}, {transform_indices = @transform_13, window_bounds = array<i64: 1, 1, 16>}]} {
    %c0 = arith.constant 0 : index
    %c0_0 = arith.constant 0 : index
    %c0_1 = arith.constant 0 : index
    %0 = vector.load %arg1[%c0, %c0_0, %c0_1] : memref<1x64x32xbf16, #tpu.memory_space<vmem>>, vector<1x64x32xbf16>
    %1 = arith.extf %0 : vector<1x64x32xbf16> to vector<1x64x32xf32>
    %cst = arith.constant dense<0.000000e+00> : vector<1x32xf32>
    %2 = vector.multi_reduction <add>, %1, %cst [1] : vector<1x64x32xf32> to vector<1x32xf32>
    %cst_2 = arith.constant 1.562500e-02 : f32
    %3 = vector.broadcast %cst_2 : f32 to vector<1x32xf32>
    %4 = arith.mulf %2, %3 : vector<1x32xf32>
    %c0_3 = arith.constant 0 : index
    %c0_4 = arith.constant 0 : index
    %5 = vector.load %arg2[%c0_3, %c0_4] : memref<1x32xf32, #tpu.memory_space<vmem>>, vector<1x32xf32>
    %6 = arith.addf %4, %5 : vector<1x32xf32>
    %7 = arith.truncf %6 : vector<1x32xf32> to vector<1x32xbf16>
    %c0_5 = arith.constant 0 : index
    %c0_6 = arith.constant 0 : index
    %8 = vector.load %arg3[%c0_5, %c0_6] : memref<64x32xf32, #tpu.memory_space<vmem>>, vector<64x32xf32>
    %9 = vector.shape_cast %8 : vector<64x32xf32> to vector<1x64x32xf32>
    %10 = arith.addf %1, %9 : vector<1x64x32xf32>
    %11 = vector.shape_cast %10 : vector<1x64x32xf32> to vector<64x32xf32>
    %12 = arith.truncf %11 : vector<64x32xf32> to vector<64x32xbf16>
    %c0_7 = arith.constant 0 : index
    %c0_8 = arith.constant 0 : index
    %13 = vector.load %arg4[%c0_7, %c0_8] : memref<32x96xbf16, #tpu.memory_space<vmem>>, vector<32x96xbf16>
    %cst_9 = arith.constant dense<0.000000e+00> : vector<1x96xf32>
    %14 = tpu.matmul %7, %13, %cst_9 {dimension_numbers = #tpu.dot_dimension_numbers<[1], [0], [0], [1], [0, 0, 1, 1], [], []>} : vector<1x32xbf16>, vector<32x96xbf16>, vector<1x96xf32> -> vector<1x96xf32>
    %c0_10 = arith.constant 0 : index
    %c0_11 = arith.constant 0 : index
    %15 = vector.load %arg5[%c0_10, %c0_11] : memref<1x96xf32, #tpu.memory_space<vmem>>, vector<1x96xf32>
    %16 = arith.addf %14, %15 : vector<1x96xf32>
    %17 = vector.extract_strided_slice %16 {offsets = [0, 0], sizes = [1, 32], strides = [1, 1]} : vector<1x96xf32> to vector<1x32xf32>
    %cst_12 = arith.constant 0.353553385 : f32
    %18 = vector.broadcast %cst_12 : f32 to vector<1x32xf32>
    %19 = arith.mulf %17, %18 : vector<1x32xf32>
    %20 = vector.extract_strided_slice %16 {offsets = [0, 32], sizes = [1, 32], strides = [1, 1]} : vector<1x96xf32> to vector<1x32xf32>
    %21 = vector.extract_strided_slice %16 {offsets = [0, 64], sizes = [1, 32], strides = [1, 1]} : vector<1x96xf32> to vector<1x32xf32>
    %22 = arith.truncf %19 : vector<1x32xf32> to vector<1x32xbf16>
    %23 = arith.truncf %20 : vector<1x32xf32> to vector<1x32xbf16>
    %c0_13 = arith.constant 0 : index
    %c0_14 = arith.constant 0 : index
    %24 = vector.load %arg6[%c0_13, %c0_14] : memref<32x32xbf16, #tpu.memory_space<vmem>>, vector<32x32xbf16>
    %cst_15 = arith.constant dense<0.000000e+00> : vector<64x32xf32>
    %25 = tpu.matmul %12, %24, %cst_15 {dimension_numbers = #tpu.dot_dimension_numbers<[1], [0], [0], [1], [0, 0, 1, 1], [], []>} : vector<64x32xbf16>, vector<32x32xbf16>, vector<64x32xf32> -> vector<64x32xf32>
    %c0_16 = arith.constant 0 : index
    %c0_17 = arith.constant 0 : index
    %26 = vector.load %arg7[%c0_16, %c0_17] : memref<1x32xf32, #tpu.memory_space<vmem>>, vector<1x32xf32>
    %27 = vector.broadcast %26 : vector<1x32xf32> to vector<64x32xf32>
    %28 = arith.addf %25, %27 : vector<64x32xf32>
    %29 = arith.truncf %28 : vector<64x32xf32> to vector<64x32xbf16>
    %30 = vector.shape_cast %29 : vector<64x32xbf16> to vector<1x64x32xbf16>
    %c0_18 = arith.constant 0 : index
    %c0_19 = arith.constant 0 : index
    %31 = vector.load %arg8[%c0_18, %c0_19] : memref<32x32xbf16, #tpu.memory_space<vmem>>, vector<32x32xbf16>
    %cst_20 = arith.constant dense<0.000000e+00> : vector<64x32xf32>
    %32 = tpu.matmul %12, %31, %cst_20 {dimension_numbers = #tpu.dot_dimension_numbers<[1], [0], [0], [1], [0, 0, 1, 1], [], []>} : vector<64x32xbf16>, vector<32x32xbf16>, vector<64x32xf32> -> vector<64x32xf32>
    %c0_21 = arith.constant 0 : index
    %c0_22 = arith.constant 0 : index
    %33 = vector.load %arg9[%c0_21, %c0_22] : memref<1x32xf32, #tpu.memory_space<vmem>>, vector<1x32xf32>
    %34 = vector.broadcast %33 : vector<1x32xf32> to vector<64x32xf32>
    %35 = arith.addf %32, %34 : vector<64x32xf32>
    %36 = arith.truncf %35 : vector<64x32xf32> to vector<64x32xbf16>
    %37 = vector.shape_cast %36 : vector<64x32xbf16> to vector<1x64x32xbf16>
    %c0_23 = arith.constant 0 : index
    %c0_24 = arith.constant 0 : index
    %38 = vector.load %arg12[%c0_23, %c0_24] : memref<32x4xbf16, #tpu.memory_space<vmem>>, vector<32x4xbf16>
    %c0_25 = arith.constant 0 : index
    %c0_26 = arith.constant 0 : index
    %39 = vector.load %arg13[%c0_25, %c0_26] : memref<4x32xbf16, #tpu.memory_space<vmem>>, vector<4x32xbf16>
    %40 = vector.shape_cast %22 : vector<1x32xbf16> to vector<1x1x32xbf16>
    %41 = vector.broadcast %40 : vector<1x1x32xbf16> to vector<1x64x32xbf16>
    %42 = arith.mulf %30, %41 : vector<1x64x32xbf16>
    %43 = vector.shape_cast %42 : vector<1x64x32xbf16> to vector<64x32xbf16>
    %cst_27 = arith.constant dense<0.000000e+00> : vector<64x4xf32>
    %44 = tpu.matmul %43, %38, %cst_27 {dimension_numbers = #tpu.dot_dimension_numbers<[1], [0], [0], [1], [0, 0, 1, 1], [], []>} : vector<64x32xbf16>, vector<32x4xbf16>, vector<64x4xf32> -> vector<64x4xf32>
    %45 = vector.shape_cast %44 : vector<64x4xf32> to vector<1x64x4xf32>
    %46 = arith.mulf %23, %22 : vector<1x32xbf16>
    %cst_28 = arith.constant dense<0.000000e+00> : vector<1x4xf32>
    %47 = tpu.matmul %46, %38, %cst_28 {dimension_numbers = #tpu.dot_dimension_numbers<[1], [0], [0], [1], [0, 0, 1, 1], [], []>} : vector<1x32xbf16>, vector<32x4xbf16>, vector<1x4xf32> -> vector<1x4xf32>
    %cst_29 = arith.constant dense<0xFF800000> : vector<1x4xf32>
    %48 = vector.multi_reduction <maximumf>, %45, %cst_29 [1] : vector<1x64x4xf32> to vector<1x4xf32>
    %49 = arith.maximumf %48, %47 : vector<1x4xf32>
    %50 = arith.subf %47, %49 : vector<1x4xf32>
    %51 = math.exp %50 : vector<1x4xf32>
    %52 = vector.shape_cast %49 : vector<1x4xf32> to vector<1x1x4xf32>
    %53 = vector.broadcast %52 : vector<1x1x4xf32> to vector<1x64x4xf32>
    %54 = arith.subf %45, %53 : vector<1x64x4xf32>
    %55 = math.exp %54 : vector<1x64x4xf32>
    %cst_30 = arith.constant dense<0.000000e+00> : vector<1x4xf32>
    %56 = vector.multi_reduction <add>, %55, %cst_30 [1] : vector<1x64x4xf32> to vector<1x4xf32>
    %57 = arith.addf %51, %56 : vector<1x4xf32>
    %58 = tpu.reciprocal %57 {approx = true} : vector<1x4xf32> -> vector<1x4xf32>
    %59 = vector.shape_cast %58 : vector<1x4xf32> to vector<1x1x4xf32>
    %60 = vector.broadcast %59 : vector<1x1x4xf32> to vector<1x64x4xf32>
    %61 = arith.mulf %55, %60 : vector<1x64x4xf32>
    %62 = arith.truncf %61 : vector<1x64x4xf32> to vector<1x64x4xbf16>
    %63 = arith.mulf %51, %58 : vector<1x4xf32>
    %64 = arith.truncf %63 : vector<1x4xf32> to vector<1x4xbf16>
    %65 = vector.shape_cast %62 : vector<1x64x4xbf16> to vector<64x4xbf16>
    %cst_31 = arith.constant dense<0.000000e+00> : vector<64x32xf32>
    %66 = tpu.matmul %65, %39, %cst_31 {dimension_numbers = #tpu.dot_dimension_numbers<[1], [0], [0], [1], [0, 0, 1, 1], [], []>} : vector<64x4xbf16>, vector<4x32xbf16>, vector<64x32xf32> -> vector<64x32xf32>
    %67 = arith.truncf %66 : vector<64x32xf32> to vector<64x32xbf16>
    %68 = vector.shape_cast %67 : vector<64x32xbf16> to vector<1x64x32xbf16>
    %cst_32 = arith.constant dense<0.000000e+00> : vector<1x32xf32>
    %69 = tpu.matmul %64, %39, %cst_32 {dimension_numbers = #tpu.dot_dimension_numbers<[1], [0], [0], [1], [0, 0, 1, 1], [], []>} : vector<1x4xbf16>, vector<4x32xbf16>, vector<1x32xf32> -> vector<1x32xf32>
    %70 = arith.mulf %68, %37 : vector<1x64x32xbf16>
    %71 = arith.extf %70 : vector<1x64x32xbf16> to vector<1x64x32xf32>
    %cst_33 = arith.constant dense<0.000000e+00> : vector<1x32xf32>
    %72 = vector.multi_reduction <add>, %71, %cst_33 [1] : vector<1x64x32xf32> to vector<1x32xf32>
    %73 = arith.mulf %69, %21 : vector<1x32xf32>
    %74 = arith.addf %72, %73 : vector<1x32xf32>
    %75 = arith.truncf %74 : vector<1x32xf32> to vector<1x32xbf16>
    %c0_34 = arith.constant 0 : index
    %c0_35 = arith.constant 0 : index
    %76 = vector.load %arg10[%c0_34, %c0_35] : memref<32x16xbf16, #tpu.memory_space<vmem>>, vector<32x16xbf16>
    %cst_36 = arith.constant dense<0.000000e+00> : vector<1x16xf32>
    %77 = tpu.matmul %75, %76, %cst_36 {dimension_numbers = #tpu.dot_dimension_numbers<[1], [0], [0], [1], [0, 0, 1, 1], [], []>} : vector<1x32xbf16>, vector<32x16xbf16>, vector<1x16xf32> -> vector<1x16xf32>
    %c0_37 = arith.constant 0 : index
    %c0_38 = arith.constant 0 : index
    %78 = vector.load %arg11[%c0_37, %c0_38] : memref<1x16xf32, #tpu.memory_space<vmem>>, vector<1x16xf32>
    %79 = arith.addf %77, %78 : vector<1x16xf32>
    %c0_39 = arith.constant 0 : index
    %c0_40 = arith.constant 0 : index
    %c0_41 = arith.constant 0 : index
    %80 = vector.load %arg14[%c0_39, %c0_40, %c0_41] : memref<1x1x16xf32, #tpu.memory_space<vmem>>, vector<1x1x16xf32>
    %81 = vector.shape_cast %80 : vector<1x1x16xf32> to vector<1x16xf32>
    %82 = vector.shape_cast %79 : vector<1x16xf32> to vector<1x1x16xf32>
    tpu.vector_store %arg14[%c0_39, %c0_40, %c0_41], %82 {strides = array<i32>} : memref<1x1x16xf32, #tpu.memory_space<vmem>>, vector<1x1x16xf32>,
    return
  }
  func.func @transform_0(%arg0: i32) -> (i32, i32, i32) {
    %c0_i32 = arith.constant 0 : i32
    %c0_i32_0 = arith.constant 0 : i32
    %c0_i32_1 = arith.constant 0 : i32
    return %arg0, %c0_i32, %c0_i32_0 : i32, i32, i32
  }
  func.func @transform_1(%arg0: i32) -> (i32, i32) {
    %c0_i32 = arith.constant 0 : i32
    %c0_i32_0 = arith.constant 0 : i32
    %c0_i32_1 = arith.constant 0 : i32
    return %c0_i32, %c0_i32_0 : i32, i32
  }
  func.func @transform_2(%arg0: i32) -> (i32, i32) {
    %c0_i32 = arith.constant 0 : i32
    %c0_i32_0 = arith.constant 0 : i32
    %c0_i32_1 = arith.constant 0 : i32
    return %c0_i32, %c0_i32_0 : i32, i32
  }
  func.func @transform_3(%arg0: i32) -> (i32, i32) {
    %c0_i32 = arith.constant 0 : i32
    %c0_i32_0 = arith.constant 0 : i32
    %c0_i32_1 = arith.constant 0 : i32
    return %c0_i32, %c0_i32_0 : i32, i32
  }
  func.func @transform_4(%arg0: i32) -> (i32, i32) {
    %c0_i32 = arith.constant 0 : i32
    %c0_i32_0 = arith.constant 0 : i32
    %c0_i32_1 = arith.constant 0 : i32
    return %c0_i32, %c0_i32_0 : i32, i32
  }
  func.func @transform_5(%arg0: i32) -> (i32, i32) {
    %c0_i32 = arith.constant 0 : i32
    %c0_i32_0 = arith.constant 0 : i32
    %c0_i32_1 = arith.constant 0 : i32
    return %c0_i32, %c0_i32_0 : i32, i32
  }
  func.func @transform_6(%arg0: i32) -> (i32, i32) {
    %c0_i32 = arith.constant 0 : i32
    %c0_i32_0 = arith.constant 0 : i32
    %c0_i32_1 = arith.constant 0 : i32
    return %c0_i32, %c0_i32_0 : i32, i32
  }
  func.func @transform_7(%arg0: i32) -> (i32, i32) {
    %c0_i32 = arith.constant 0 : i32
    %c0_i32_0 = arith.constant 0 : i32
    %c0_i32_1 = arith.constant 0 : i32
    return %c0_i32, %c0_i32_0 : i32, i32
  }
  func.func @transform_8(%arg0: i32) -> (i32, i32) {
    %c0_i32 = arith.constant 0 : i32
    %c0_i32_0 = arith.constant 0 : i32
    %c0_i32_1 = arith.constant 0 : i32
    return %c0_i32, %c0_i32_0 : i32, i32
  }
  func.func @transform_9(%arg0: i32) -> (i32, i32) {
    %c0_i32 = arith.constant 0 : i32
    %c0_i32_0 = arith.constant 0 : i32
    %c0_i32_1 = arith.constant 0 : i32
    return %c0_i32, %c0_i32_0 : i32, i32
  }
  func.func @transform_10(%arg0: i32) -> (i32, i32) {
    %c0_i32 = arith.constant 0 : i32
    %c0_i32_0 = arith.constant 0 : i32
    %c0_i32_1 = arith.constant 0 : i32
    return %c0_i32, %c0_i32_0 : i32, i32
  }
  func.func @transform_11(%arg0: i32) -> (i32, i32) {
    %c0_i32 = arith.constant 0 : i32
    %c0_i32_0 = arith.constant 0 : i32
    %c0_i32_1 = arith.constant 0 : i32
    return %c0_i32, %c0_i32_0 : i32, i32
  }
  func.func @transform_12(%arg0: i32) -> (i32, i32) {
    %c0_i32 = arith.constant 0 : i32
    %c0_i32_0 = arith.constant 0 : i32
    %c0_i32_1 = arith.constant 0 : i32
    return %c0_i32, %c0_i32_0 : i32, i32
  }
  func.func @transform_13(%arg0: i32) -> (i32, i32, i32) {
    %c0_i32 = arith.constant 0 : i32
    %c0_i32_0 = arith.constant 0 : i32
    %c0_i32_1 = arith.constant 0 : i32
    return %arg0, %c0_i32, %c0_i32_0 : i32, i32, i32
  }
}

module attributes {stable_mosaic.version = 11 : i64} {
  func.func @attention_pool_kernel(%arg0: i32, %arg1: memref<1x64x32xbf16, #tpu.memory_space<vmem>>, %arg2: memref<1x32xf32, #tpu.memory_space<vmem>>, %arg3: memref<64x32xf32, #tpu.memory_space<vmem>>, %arg4: memref<32x96xbf16, #tpu.memory_space<vmem>>, %arg5: memref<1x96xf32, #tpu.memory_space<vmem>>, %arg6: memref<32x32xbf16, #tpu.memory_space<vmem>>, %arg7: memref<1x32xf32, #tpu.memory_space<vmem>>, %arg8: memref<32x32xbf16, #tpu.memory_space<vmem>>, %arg9: memref<1x32xf32, #tpu.memory_space<vmem>>, %arg10: memref<32x16xbf16, #tpu.memory_space<vmem>>, %arg11: memref<1x16xf32, #tpu.memory_space<vmem>>, %arg12: memref<32x4xbf16, #tpu.memory_space<vmem>>, %arg13: memref<4x32xbf16, #tpu.memory_space<vmem>>, %arg14: memref<1x1x16xf32, #tpu.memory_space<vmem>>) attributes {dimension_semantics = [#tpu.dimension_semantics<parallel>], iteration_bounds = array<i64: 2>, scalar_prefetch = 0 : i64, scratch_operands = 0 : i64, tpu.core_type = #tpu.core_type<tc>, window_params = [{transform_indices = @transform_0, window_bounds = array<i64: 1, 64, 32>}, {pipeline_mode = #tpu.pipeline_mode<synchronous>, transform_indices = @transform_1, window_bounds = array<i64: 1, 32>}, {pipeline_mode = #tpu.pipeline_mode<synchronous>, transform_indices = @transform_2, window_bounds = array<i64: 64, 32>}, {pipeline_mode = #tpu.pipeline_mode<synchronous>, transform_indices = @transform_3, window_bounds = array<i64: 32, 96>}, {pipeline_mode = #tpu.pipeline_mode<synchronous>, transform_indices = @transform_4, window_bounds = array<i64: 1, 96>}, {pipeline_mode = #tpu.pipeline_mode<synchronous>, transform_indices = @transform_5, window_bounds = array<i64: 32, 32>}, {pipeline_mode = #tpu.pipeline_mode<synchronous>, transform_indices = @transform_6, window_bounds = array<i64: 1, 32>}, {pipeline_mode = #tpu.pipeline_mode<synchronous>, transform_indices = @transform_7, window_bounds = array<i64: 32, 32>}, {pipeline_mode = #tpu.pipeline_mode<synchronous>, transform_indices = @transform_8, window_bounds = array<i64: 1, 32>}, {pipeline_mode = #tpu.pipeline_mode<synchronous>, transform_indices = @transform_9, window_bounds = array<i64: 32, 16>}, {pipeline_mode = #tpu.pipeline_mode<synchronous>, transform_indices = @transform_10, window_bounds = array<i64: 1, 16>}, {pipeline_mode = #tpu.pipeline_mode<synchronous>, transform_indices = @transform_11, window_bounds = array<i64: 32, 4>}, {pipeline_mode = #tpu.pipeline_mode<synchronous>, transform_indices = @transform_12, window_bounds = array<i64: 4, 32>}, {transform_indices = @transform_13, window_bounds = array<i64: 1, 1, 16>}]} {
    %c0 = arith.constant 0 : index
    %c0_0 = arith.constant 0 : index
    %c0_1 = arith.constant 0 : index
    %0 = vector.load %arg1[%c0, %c0_0, %c0_1] : memref<1x64x32xbf16, #tpu.memory_space<vmem>>, vector<1x64x32xbf16>
    %1 = arith.extf %0 : vector<1x64x32xbf16> to vector<1x64x32xf32>
    %cst = arith.constant dense<0.000000e+00> : vector<1x32xf32>
    %2 = vector.multi_reduction <add>, %1, %cst [1] : vector<1x64x32xf32> to vector<1x32xf32>
    %cst_2 = arith.constant 1.562500e-02 : f32
    %3 = vector.broadcast %cst_2 : f32 to vector<1x32xf32>
    %4 = arith.mulf %2, %3 : vector<1x32xf32>
    %c0_3 = arith.constant 0 : index
    %c0_4 = arith.constant 0 : index
    %5 = vector.load %arg2[%c0_3, %c0_4] : memref<1x32xf32, #tpu.memory_space<vmem>>, vector<1x32xf32>
    %6 = arith.addf %4, %5 : vector<1x32xf32>
    %7 = arith.truncf %6 : vector<1x32xf32> to vector<1x32xbf16>
    %c0_5 = arith.constant 0 : index
    %c0_6 = arith.constant 0 : index
    %8 = vector.load %arg3[%c0_5, %c0_6] : memref<64x32xf32, #tpu.memory_space<vmem>>, vector<64x32xf32>
    %9 = vector.shape_cast %8 : vector<64x32xf32> to vector<1x64x32xf32>
    %10 = arith.addf %1, %9 : vector<1x64x32xf32>
    %11 = vector.shape_cast %10 : vector<1x64x32xf32> to vector<64x32xf32>
    %12 = arith.truncf %11 : vector<64x32xf32> to vector<64x32xbf16>
    %c0_7 = arith.constant 0 : index
    %c0_8 = arith.constant 0 : index
    %13 = vector.load %arg4[%c0_7, %c0_8] : memref<32x96xbf16, #tpu.memory_space<vmem>>, vector<32x96xbf16>
    %cst_9 = arith.constant dense<0.000000e+00> : vector<1x96xf32>
    %14 = tpu.matmul %7, %13, %cst_9 {dimension_numbers = #tpu.dot_dimension_numbers<[1], [0], [0], [1], [0, 0, 1, 1], [], []>} : vector<1x32xbf16>, vector<32x96xbf16>, vector<1x96xf32> -> vector<1x96xf32>
    %c0_10 = arith.constant 0 : index
    %c0_11 = arith.constant 0 : index
    %15 = vector.load %arg5[%c0_10, %c0_11] : memref<1x96xf32, #tpu.memory_space<vmem>>, vector<1x96xf32>
    %16 = arith.addf %14, %15 : vector<1x96xf32>
    %17 = vector.extract_strided_slice %16 {offsets = [0, 0], sizes = [1, 32], strides = [1, 1]} : vector<1x96xf32> to vector<1x32xf32>
    %cst_12 = arith.constant 0.353553385 : f32
    %18 = vector.broadcast %cst_12 : f32 to vector<1x32xf32>
    %19 = arith.mulf %17, %18 : vector<1x32xf32>
    %20 = vector.extract_strided_slice %16 {offsets = [0, 32], sizes = [1, 32], strides = [1, 1]} : vector<1x96xf32> to vector<1x32xf32>
    %21 = vector.extract_strided_slice %16 {offsets = [0, 64], sizes = [1, 32], strides = [1, 1]} : vector<1x96xf32> to vector<1x32xf32>
    %22 = arith.truncf %19 : vector<1x32xf32> to vector<1x32xbf16>
    %23 = arith.truncf %20 : vector<1x32xf32> to vector<1x32xbf16>
    %c0_13 = arith.constant 0 : index
    %c0_14 = arith.constant 0 : index
    %24 = vector.load %arg6[%c0_13, %c0_14] : memref<32x32xbf16, #tpu.memory_space<vmem>>, vector<32x32xbf16>
    %cst_15 = arith.constant dense<0.000000e+00> : vector<64x32xf32>
    %25 = tpu.matmul %12, %24, %cst_15 {dimension_numbers = #tpu.dot_dimension_numbers<[1], [0], [0], [1], [0, 0, 1, 1], [], []>} : vector<64x32xbf16>, vector<32x32xbf16>, vector<64x32xf32> -> vector<64x32xf32>
    %c0_16 = arith.constant 0 : index
    %c0_17 = arith.constant 0 : index
    %26 = vector.load %arg7[%c0_16, %c0_17] : memref<1x32xf32, #tpu.memory_space<vmem>>, vector<1x32xf32>
    %27 = vector.broadcast %26 : vector<1x32xf32> to vector<64x32xf32>
    %28 = arith.addf %25, %27 : vector<64x32xf32>
    %29 = arith.truncf %28 : vector<64x32xf32> to vector<64x32xbf16>
    %30 = vector.shape_cast %29 : vector<64x32xbf16> to vector<1x64x32xbf16>
    %c0_18 = arith.constant 0 : index
    %c0_19 = arith.constant 0 : index
    %31 = vector.load %arg8[%c0_18, %c0_19] : memref<32x32xbf16, #tpu.memory_space<vmem>>, vector<32x32xbf16>
    %cst_20 = arith.constant dense<0.000000e+00> : vector<64x32xf32>
    %32 = tpu.matmul %12, %31, %cst_20 {dimension_numbers = #tpu.dot_dimension_numbers<[1], [0], [0], [1], [0, 0, 1, 1], [], []>} : vector<64x32xbf16>, vector<32x32xbf16>, vector<64x32xf32> -> vector<64x32xf32>
    %c0_21 = arith.constant 0 : index
    %c0_22 = arith.constant 0 : index
    %33 = vector.load %arg9[%c0_21, %c0_22] : memref<1x32xf32, #tpu.memory_space<vmem>>, vector<1x32xf32>
    %34 = vector.broadcast %33 : vector<1x32xf32> to vector<64x32xf32>
    %35 = arith.addf %32, %34 : vector<64x32xf32>
    %36 = arith.truncf %35 : vector<64x32xf32> to vector<64x32xbf16>
    %37 = vector.shape_cast %36 : vector<64x32xbf16> to vector<1x64x32xbf16>
    %c0_23 = arith.constant 0 : index
    %c0_24 = arith.constant 0 : index
    %38 = vector.load %arg12[%c0_23, %c0_24] : memref<32x4xbf16, #tpu.memory_space<vmem>>, vector<32x4xbf16>
    %c0_25 = arith.constant 0 : index
    %c0_26 = arith.constant 0 : index
    %39 = vector.load %arg13[%c0_25, %c0_26] : memref<4x32xbf16, #tpu.memory_space<vmem>>, vector<4x32xbf16>
    %40 = vector.shape_cast %22 : vector<1x32xbf16> to vector<1x1x32xbf16>
    %41 = vector.broadcast %40 : vector<1x1x32xbf16> to vector<1x64x32xbf16>
    %42 = arith.mulf %30, %41 : vector<1x64x32xbf16>
    %43 = vector.shape_cast %42 : vector<1x64x32xbf16> to vector<64x32xbf16>
    %cst_27 = arith.constant dense<0.000000e+00> : vector<64x4xf32>
    %44 = tpu.matmul %43, %38, %cst_27 {dimension_numbers = #tpu.dot_dimension_numbers<[1], [0], [0], [1], [0, 0, 1, 1], [], []>} : vector<64x32xbf16>, vector<32x4xbf16>, vector<64x4xf32> -> vector<64x4xf32>
    %45 = vector.shape_cast %44 : vector<64x4xf32> to vector<1x64x4xf32>
    %46 = arith.mulf %23, %22 : vector<1x32xbf16>
    %cst_28 = arith.constant dense<0.000000e+00> : vector<1x4xf32>
    %47 = tpu.matmul %46, %38, %cst_28 {dimension_numbers = #tpu.dot_dimension_numbers<[1], [0], [0], [1], [0, 0, 1, 1], [], []>} : vector<1x32xbf16>, vector<32x4xbf16>, vector<1x4xf32> -> vector<1x4xf32>
    %cst_29 = arith.constant dense<0xFF800000> : vector<1x4xf32>
    %48 = vector.multi_reduction <maximumf>, %45, %cst_29 [1] : vector<1x64x4xf32> to vector<1x4xf32>
    %49 = arith.maximumf %48, %47 : vector<1x4xf32>
    %50 = arith.subf %47, %49 : vector<1x4xf32>
    %51 = math.exp %50 : vector<1x4xf32>
    %52 = vector.shape_cast %49 : vector<1x4xf32> to vector<1x1x4xf32>
    %53 = vector.broadcast %52 : vector<1x1x4xf32> to vector<1x64x4xf32>
    %54 = arith.subf %45, %53 : vector<1x64x4xf32>
    %55 = math.exp %54 : vector<1x64x4xf32>
    %cst_30 = arith.constant dense<0.000000e+00> : vector<1x4xf32>
    %56 = vector.multi_reduction <add>, %55, %cst_30 [1] : vector<1x64x4xf32> to vector<1x4xf32>
    %57 = arith.addf %51, %56 : vector<1x4xf32>
    %58 = tpu.reciprocal %57 {approx = true} : vector<1x4xf32> -> vector<1x4xf32>
    %59 = vector.shape_cast %58 : vector<1x4xf32> to vector<1x1x4xf32>
    %60 = vector.broadcast %59 : vector<1x1x4xf32> to vector<1x64x4xf32>
    %61 = arith.mulf %55, %60 : vector<1x64x4xf32>
    %62 = arith.truncf %61 : vector<1x64x4xf32> to vector<1x64x4xbf16>
    %63 = arith.mulf %51, %58 : vector<1x4xf32>
    %64 = arith.truncf %63 : vector<1x4xf32> to vector<1x4xbf16>
    %65 = vector.shape_cast %62 : vector<1x64x4xbf16> to vector<64x4xbf16>
    %cst_31 = arith.constant dense<0.000000e+00> : vector<64x32xf32>
    %66 = tpu.matmul %65, %39, %cst_31 {dimension_numbers = #tpu.dot_dimension_numbers<[1], [0], [0], [1], [0, 0, 1, 1], [], []>} : vector<64x4xbf16>, vector<4x32xbf16>, vector<64x32xf32> -> vector<64x32xf32>
    %67 = arith.truncf %66 : vector<64x32xf32> to vector<64x32xbf16>
    %68 = vector.shape_cast %67 : vector<64x32xbf16> to vector<1x64x32xbf16>
    %cst_32 = arith.constant dense<0.000000e+00> : vector<1x32xf32>
    %69 = tpu.matmul %64, %39, %cst_32 {dimension_numbers = #tpu.dot_dimension_numbers<[1], [0], [0], [1], [0, 0, 1, 1], [], []>} : vector<1x4xbf16>, vector<4x32xbf16>, vector<1x32xf32> -> vector<1x32xf32>
    %70 = arith.mulf %68, %37 : vector<1x64x32xbf16>
    %71 = arith.extf %70 : vector<1x64x32xbf16> to vector<1x64x32xf32>
    %cst_33 = arith.constant dense<0.000000e+00> : vector<1x32xf32>
    %72 = vector.multi_reduction <add>, %71, %cst_33 [1] : vector<1x64x32xf32> to vector<1x32xf32>
    %73 = arith.mulf %69, %21 : vector<1x32xf32>
    %74 = arith.addf %72, %73 : vector<1x32xf32>
    %75 = arith.truncf %74 : vector<1x32xf32> to vector<1x32xbf16>
    %c0_34 = arith.constant 0 : index
    %c0_35 = arith.constant 0 : index
    %76 = vector.load %arg10[%c0_34, %c0_35] : memref<32x16xbf16, #tpu.memory_space<vmem>>, vector<32x16xbf16>
    %cst_36 = arith.constant dense<0.000000e+00> : vector<1x16xf32>
    %77 = tpu.matmul %75, %76, %cst_36 {dimension_numbers = #tpu.dot_dimension_numbers<[1], [0], [0], [1], [0, 0, 1, 1], [], []>} : vector<1x32xbf16>, vector<32x16xbf16>, vector<1x16xf32> -> vector<1x16xf32>
    %c0_37 = arith.constant 0 : index
    %c0_38 = arith.constant 0 : index
    %78 = vector.load %arg11[%c0_37, %c0_38] : memref<1x16xf32, #tpu.memory_space<vmem>>, vector<1x16xf32>
    %79 = arith.addf %77, %78 : vector<1x16xf32>
    %c0_39 = arith.constant 0 : index
    %c0_40 = arith.constant 0 : index
    %c0_41 = arith.constant 0 : index
    %80 = vector.load %arg14[%c0_39, %c0_40, %c0_41] : memref<1x1x16xf32, #tpu.memory_space<vmem>>, vector<1x1x16xf32>
    %81 = vector.shape_cast %80 : vector<1x1x16xf32> to vector<1x16xf32>
    %82 = vector.shape_cast %79 : vector<1x16xf32> to vector<1x1x16xf32>
    tpu.vector_store %arg14[%c0_39, %c0_40, %c0_41], %82 {strides = array<i32>} : memref<1x1x16xf32, #tpu.memory_space<vmem>>, vector<1x1x16xf32>,
    return
  }
  func.func @transform_0(%arg0: i32) -> (i32, i32, i32) {
    %c0_i32 = arith.constant 0 : i32
    %c0_i32_0 = arith.constant 0 : i32
    %c0_i32_1 = arith.constant 0 : i32
    return %arg0, %c0_i32, %c0_i32_0 : i32, i32, i32
  }
  func.func @transform_1(%arg0: i32) -> (i32, i32) {
    %c0_i32 = arith.constant 0 : i32
    %c0_i32_0 = arith.constant 0 : i32
    %c0_i32_1 = arith.constant 0 : i32
    return %c0_i32, %c0_i32_0 : i32, i32
  }
  func.func @transform_2(%arg0: i32) -> (i32, i32) {
    %c0_i32 = arith.constant 0 : i32
    %c0_i32_0 = arith.constant 0 : i32
    %c0_i32_1 = arith.constant 0 : i32
    return %c0_i32, %c0_i32_0 : i32, i32
  }
  func.func @transform_3(%arg0: i32) -> (i32, i32) {
    %c0_i32 = arith.constant 0 : i32
    %c0_i32_0 = arith.constant 0 : i32
    %c0_i32_1 = arith.constant 0 : i32
    return %c0_i32, %c0_i32_0 : i32, i32
  }
  func.func @transform_4(%arg0: i32) -> (i32, i32) {
    %c0_i32 = arith.constant 0 : i32
    %c0_i32_0 = arith.constant 0 : i32
    %c0_i32_1 = arith.constant 0 : i32
    return %c0_i32, %c0_i32_0 : i32, i32
  }
  func.func @transform_5(%arg0: i32) -> (i32, i32) {
    %c0_i32 = arith.constant 0 : i32
    %c0_i32_0 = arith.constant 0 : i32
    %c0_i32_1 = arith.constant 0 : i32
    return %c0_i32, %c0_i32_0 : i32, i32
  }
  func.func @transform_6(%arg0: i32) -> (i32, i32) {
    %c0_i32 = arith.constant 0 : i32
    %c0_i32_0 = arith.constant 0 : i32
    %c0_i32_1 = arith.constant 0 : i32
    return %c0_i32, %c0_i32_0 : i32, i32
  }
  func.func @transform_7(%arg0: i32) -> (i32, i32) {
    %c0_i32 = arith.constant 0 : i32
    %c0_i32_0 = arith.constant 0 : i32
    %c0_i32_1 = arith.constant 0 : i32
    return %c0_i32, %c0_i32_0 : i32, i32
  }
  func.func @transform_8(%arg0: i32) -> (i32, i32) {
    %c0_i32 = arith.constant 0 : i32
    %c0_i32_0 = arith.constant 0 : i32
    %c0_i32_1 = arith.constant 0 : i32
    return %c0_i32, %c0_i32_0 : i32, i32
  }
  func.func @transform_9(%arg0: i32) -> (i32, i32) {
    %c0_i32 = arith.constant 0 : i32
    %c0_i32_0 = arith.constant 0 : i32
    %c0_i32_1 = arith.constant 0 : i32
    return %c0_i32, %c0_i32_0 : i32, i32
  }
  func.func @transform_10(%arg0: i32) -> (i32, i32) {
    %c0_i32 = arith.constant 0 : i32
    %c0_i32_0 = arith.constant 0 : i32
    %c0_i32_1 = arith.constant 0 : i32
    return %c0_i32, %c0_i32_0 : i32, i32
  }
  func.func @transform_11(%arg0: i32) -> (i32, i32) {
    %c0_i32 = arith.constant 0 : i32
    %c0_i32_0 = arith.constant 0 : i32
    %c0_i32_1 = arith.constant 0 : i32
    return %c0_i32, %c0_i32_0 : i32, i32
  }
  func.func @transform_12(%arg0: i32) -> (i32, i32) {
    %c0_i32 = arith.constant 0 : i32
    %c0_i32_0 = arith.constant 0 : i32
    %c0_i32_1 = arith.constant 0 : i32
    return %c0_i32, %c0_i32_0 : i32, i32
  }
  func.func @transform_13(%arg0: i32) -> (i32, i32, i32) {
    %c0_i32 = arith.constant 0 : i32
    %c0_i32_0 = arith.constant 0 : i32
    %c0_i32_1 = arith.constant 0 : i32
    return %arg0, %c0_i32, %c0_i32_0 : i32, i32, i32
  }
}

</mosaic_0001>

<bundles_post_ra>
// kernel: attention_pool_2d.1
= control target key start
LH: loop header
LB: loop body
LE: loop exit
PB: predicated region body
PF: predicated region fallthrough
CT: control target
= control target key end

     0   :  { %s1991_s0 = inlined_call_operand.vmem [shape: bf16[2,64,32], index: 0, kind: input, shape index: {}]   ;;  %s1992_s1 = inlined_call_operand.vmem [shape: f32[1,32], index: 1, kind: input, shape index: {}]   ;;  %s1993_s2 = inlined_call_operand.vmem [shape: f32[64,32], index: 2, kind: input, shape index: {}]   ;;  %s1994_s3 = inlined_call_operand.vmem [shape: bf16[32,96], index: 3, kind: input, shape index: {}]   ;;  %s1995_s4 = inlined_call_operand.vmem [shape: f32[1,96], index: 4, kind: input, shape index: {}]   ;;  %s1996_s5 = inlined_call_operand.vmem [shape: bf16[32,32], index: 5, kind: input, shape index: {}]   ;;  %s1997_s6 = inlined_call_operand.vmem [shape: f32[1,32], index: 6, kind: input, shape index: {}]   ;;  %s1998_s7 = inlined_call_operand.vmem [shape: bf16[32,32], index: 7, kind: input, shape index: {}]   ;;  %s1999_s8 = inlined_call_operand.vmem [shape: f32[1,32], index: 8, kind: input, shape index: {}]   ;;  %s2000_s9 = inlined_call_operand.vmem [shape: bf16[32,16], index: 9, kind: input, shape index: {}]   ;;  %s2001_s10 = inlined_call_operand.vmem [shape: f32[1,16], index: 10, kind: input, shape index: {}]   ;;  %s2002_s11 = inlined_call_operand.vmem [shape: bf16[32,4], index: 11, kind: input, shape index: {}]   ;;  %s2003_s12 = inlined_call_operand.vmem [shape: bf16[4,32], index: 12, kind: input, shape index: {}]   ;;  %s2004_s13 = inlined_call_operand.hbm [shape: f32[2,1,16], index: 13, kind: output, shape index: {}]  }
   0x1   :  { %2005 = sst [smem:[#allocation6_spill]] %s1994_s3 }
   0x2   :  { %2006 = sst [smem:[#allocation7_spill]] %s1996_s5 }
   0x3   :  { %18 = vsyncpa [#allocation3], 0 }
   0x4   :  { %20 = vsyncpa [#allocation3 + $0x1], 0  ;;  %s1695_s25 = smov 0   ;;  %s1697_s26 = smov 0  }
   0x5   :  { %s1699_s27 = smov 0   ;;  %s1701_s28 = smov 0  }
   0x6 LB: > { %s1716_s29 = sadd.s32 4294967295, %s1617_s28   ;;  %s1309_s30 = sadd.s32 4294967294, %s1617_s28   ;;  %s1617_s28 = sphi %s1701_s28, %s2016_s28   ;;  %s1613_s27 = sphi %s1699_s27, %s2015_s27   ;;  %s1609_s26 = sphi %s1697_s26, %s2014_s26   ;;  %s1605_s25 = sphi %s1695_s25, %s2013_s25  }
   0x7   : > { %s1720_s14 = sadd.s32 1, %s1617_s28   ;;  %s311_s15 = sadd.s32 1, %s1613_s27 }
   0x8   : > { %s308_s16 = ssub.s32 %s1617_s28, %s1720_s14  ;;  %p321_p0 = scmp.ne.s32.totalorder %s1613_s27, %s1609_s26 }
   0x9   : > { %p309_p1 = scmp.eq.s32.totalorder %s308_s16, 0  ;;  %p322_p2 = scmp.eq.s32.totalorder %s1716_s29, 1 }
   0xa   : > { %p327_p3 = scmp.ne.s32.totalorder %s1609_s26, %s1605_s25  ;;  %p328_p4 = scmp.eq.s32.totalorder %s1309_s30, 1 }
   0xb   : > { %s1731_s17 = scalar_select %p309_p1, %s1613_s27, %s311_s15  }
   0xc   : > { %p1733_p5 = por %p322_p2, %p321_p0  ;;  %p1737_p6 = por %p328_p4, %p327_p3 }
   0xd   : > { %2007 = sst [smem:[#allocation5_spill]] %s1731_s17  ;;  %p1312_p7 = scmp.ge.s32.totalorder %s1617_s28, 1 }
   0xe   : > { %p390_p8 = scmp.lt.s32.totalorder %s1617_s28, 3 }
  0x10   : > { %p391_p9 = pnand %p1312_p7, %p390_p8 }
  0x11   : > { %s2010_s5 = sld [smem:[#allocation7_spill]] (!%p391_p9)  ;;  %v1619_v2 = vmov (!%p391_p9), 0.0   ;;  %p433_p10 = scmp.lt.s32.totalorder (!%p391_p9), %s1716_s29, 1  ;;  %vm1620_vm0 = vmmov (!%p391_p9), 0   ;;  %v481_v5 = vld [vmem:[%s1993_s2] sm:$0xff] (!%p391_p9)  ;;  %v482_v6 = vld [vmem:[%s1993_s2 + $0x8] sm:$0xff] (!%p391_p9) }
  0x12   : > { %394 = sbr.rel (%p391_p9) target bundleno = 1276 (0x4fc), region = 72  ;;  %1404 = vmatprep.subr.bf16.mxu0 (!%p391_p9), %v1619_v2  ;;  %s2011_s3 = sld [smem:[#allocation6_spill]] (!%p391_p9)  ;;  %1408 = vmatprep.mubr.msk.bf16.mxu0 (!%p391_p9), %vm1620_vm0, %v1619_v2  ;;  %vm455_vm1 = vcmask (!%p391_p9), 261120   ;;  %v483_v10 = vld [vmem:[%s1993_s2 + $0x10] sm:$0xff] (!%p391_p9)  ;;  %v484_v11 = vld [vmem:[%s1993_s2 + $0x18] sm:$0xff] (!%p391_p9)  ;;  %v485_v15 = vld [vmem:[%s1993_s2 + $0x20] sm:$0xff] (!%p391_p9) }
  0x13   : > { %v486_v25 = vld [vmem:[%s1993_s2 + $0x28] sm:$0xff] (!%p391_p9)  ;;  %v487_v30 = vld [vmem:[%s1993_s2 + $0x30] sm:$0xff] (!%p391_p9)  ;;  %v488_v35 = vld [vmem:[%s1993_s2 + $0x38] sm:$0xff] (!%p391_p9)  ;;  %s1622_s17 = smov (!%p391_p9), 32   ;;  %vm916_vm2 = vcmask (!%p391_p9), 31744   ;;  %vm1023_vm3 = vcmask (!%p391_p9), 1041408  }
  0x14   : > { %v478_v58 = vld [vmem:[%s1992_s1] sm:$0x1] (!%p391_p9)  ;;  %v1530_v63 = vld [vmem:[%s2002_s11 + $0x8] sm:$0xff] (!%p391_p9)   ;;  %vm1239_vm4 = vcmask (!%p391_p9), 122880   ;;  %s1624_s22 = smov (!%p391_p9), [#allocation2]  }
  0x15   : > { %v1529_v62 = vld [vmem:[%s2002_s11] sm:$0xff] (!%p391_p9)  }
  0x17   : > { %v1525_v0 = vld [vmem:[%s2010_s5] sm:$0xff] (!%p391_p9)   ;;  %v1526_v1 = vld [vmem:[%s2010_s5 + $0x8] sm:$0xff] (!%p391_p9)   ;;  %s1621_s5 = smov (!%p391_p9), 64  }
  0x18   : > { %1412 = vmatprep.subr.bf16.mxu1 (!%p391_p9), %v1525_v0  ;;  %v1527_v3 = vld [vmem:[%s2011_s3] sm:$0xff] (!%p391_p9)   ;;  %v1528_v4 = vld [vmem:[%s2011_s3 + $0x8] sm:$0xff] (!%p391_p9)   ;;  %s1623_s3 = smov (!%p391_p9), 96  }
  0x19   : > { %1413 = vmatpush3.bf16.msra.mxu1 %v1525_v0  ;;  %s434_s15 = scalar_select %p433_p10, %s1716_s29, 1  ;;  %1405 = vmatpush3.bf16.msra.mxu0 %v1527_v3  ;;  %v1318_v0 = vld [vmem:[%s1997_s6] ss:$0 sm:$0xff] }
  0x1a   : > { %1414 = vmatprep.subr.bf16.mxu1 %v1526_v1  ;;  %1406 = vmatprep.subr.bf16.mxu0 %v1619_v2 }
  0x1b   : > { %s1350_s16 = sshll.u32 %s434_s15, 5 }
  0x1c   : > { %s437_s24 = scalar_lea.vmem %s1991_s0, %s1350_s16  ;;  %s1347_s16 = sshll.u32 %s1716_s29, 4 }
  0x1d   : > { %1415 = vmatpush3.bf16.msra.mxu1 %v1526_v1  ;;  %v1352_v7 = vld [vmem:[%s437_s24] sm:$0xff]   ;;  %v1367_v8 = vld [vmem:[%s437_s24 + $0x8] sm:$0xff]   ;;  %v1368_v9 = vld [vmem:[%s437_s24 + $0x10] sm:$0xff]   ;;  %1407 = vmatpush3.bf16.msra.mxu0 %v1528_v4  ;;  %s1949_s20 = scalar_lea.hbm %s2004_s13, %s1347_s16 }
  0x1e   : > { %v1353_v12 = vunpack.c.l.bf16 %v1352_v7  ;;  %v1354_v13 = vunpack.c.h.bf16 %v1352_v7  ;;  %v1357_v14 = vunpack.c.l.bf16 %v1367_v8  ;;  %v1361_v16 = vunpack.c.l.bf16 %v1368_v9  ;;  %v1369_v18 = vld [vmem:[%s437_s24 + $0x18] sm:$0xff]   ;;  %1436 = vmatprep.subr.bf16.mxu1 %v1529_v62 }
  0x1f   : > { %v1358_v17 = vunpack.c.h.bf16 %v1367_v8  ;;  %v1362_v26 = vunpack.c.h.bf16 %v1368_v9  ;;  %v1365_v31 = vunpack.c.l.bf16 %v1369_v18  ;;  %v1366_v36 = vunpack.c.h.bf16 %v1369_v18 }
  0x20   : > { %v456_v19 = vsel %vm455_vm1, %v1353_v12, 0.0  ;;  %v457_v20 = vsel %vm455_vm1, %v1354_v13, 0.0  ;;  %v459_v21 = vsel %vm455_vm1, %v1357_v14, 0.0  ;;  %v489_v22 = vadd.f32 %v1353_v12, %v481_v5 }
  0x21   : > { %v458_v23 = vadd.f32 %v457_v20, %v456_v19  ;;  %v490_v24 = vadd.f32 %v1354_v13, %v482_v6  ;;  %v461_v27 = vsel %vm455_vm1, %v1358_v17, 0.0  ;;  %v491_v28 = vadd.f32 %v1357_v14, %v483_v10 }
  0x22   : > { %v492_v29 = vadd.f32 %v1358_v17, %v484_v11  ;;  %v493_v34 = vadd.f32 %v1361_v16, %v485_v15  ;;  %v463_v37 = vsel %vm455_vm1, %v1361_v16, 0.0  ;;  %v494_v39 = vadd.f32 %v1362_v26, %v486_v25  ;;  %v505_v25 = vld [vmem:[%s1995_s4] sm:$0x1] }
  0x23   : > { %v460_v32 = vadd.f32 %v459_v21, %v458_v23  ;;  %v497_v33 = vpack.c.bf16 %v490_v24, %v489_v22  ;;  %v465_v41 = vsel %vm455_vm1, %v1362_v26, 0.0  ;;  %v495_v43 = vadd.f32 %v1365_v31, %v487_v30  ;;  %v1531_v22 = vld [vmem:[%s1998_s7] sm:$0xff]   ;;  %v1532_v23 = vld [vmem:[%s1998_s7 + $0x8] sm:$0xff]  }
  0x24   : > { %v1793_v38 = vpack.c.bf16 %v492_v29, %v491_v28  ;;  %v1799_v42 = vpack.c.bf16 %v494_v39, %v493_v34  ;;  %v496_v44 = vadd.f32 %v1366_v36, %v488_v35  ;;  %v467_v46 = vsel %vm455_vm1, %v1365_v31, 0.0  ;;  %1424 = vmatprep.subr.bf16.mxu0 %v1531_v22 }
  0x25   : > { %1416 = vmatprep.mubr.msk.bf16.mxu1 %vm455_vm1, %v497_v33  ;;  %v462_v40 = vadd.f32 %v461_v27, %v460_v32  ;;  %v469_v48 = vsel %vm455_vm1, %v1366_v36, 0.0  ;;  %v768_v24 = vlaneseq }
  0x26   : > { %1417 = vmatmul.mubr.msk.bf16.vlgmr.msra.gmra.mrb[0].mxu1 %vm455_vm1, %v1793_v38  ;;  %v1805_v49 = vpack.c.bf16 %v496_v44, %v495_v43  ;;  %v1325_v44 = vld [vmem:[%s1999_s8] ss:$0 sm:$0xff] }
  0x27   : > { %v464_v45 = vadd.f32 %v463_v37, %v462_v40  ;;  %1420 = vmatprep.mubr.msk.bf16.mxu1 %vm455_vm1, %v1799_v42  ;;  %1437 = vmatpush3.bf16.msra.mxu1 %v1529_v62  ;;  %v769_v29 = vshrl.u32 %v768_v24, 7 }
  0x28   : > { %1438 = vmatprep.subr.bf16.mxu1 %v1530_v63 }
  0x29   : > { %v466_v47 = vadd.f32 %v465_v41, %v464_v45  ;;  %v1834_v34 = vsub.s32 0, %v769_v29 }
  0x2b   : > { %v468_v50 = vadd.f32 %v467_v46, %v466_v47  ;;  %1439 = vmatpush3.bf16.msra.mxu1 %v1530_v63 }
  0x2c   : > { %1466 = vmatprep.subr.bf16.mxu1 %v1619_v2 }
  0x2d   : > { %v470_v51 = vadd.f32 %v469_v48, %v468_v50 }
  0x2e   : > { %1421 = vmatmul.mubr.msk.bf16.gmra.mrb[4].mxu1 %vm455_vm1, %v1805_v49 }
  0x2f   : > { %v471_v52 = vrot.slane %v470_v51, 4 }
  0x31   : > { %v472_v53 = vadd.f32 %v471_v52, %v470_v51 }
  0x33   : > { %v473_v54 = vrot.slane %v472_v53, 2 }
  0x35   : > { %v474_v55 = vadd.f32 %v473_v54, %v472_v53 }
  0x37   : > { %v475_v56 = vrot.slane %v474_v55, 1 }
  0x39   : > { %v476_v57 = vadd.f32 %v475_v56, %v474_v55 }
  0x3b   : > { %v477_v59 = vmul.f32 0.015625, %v476_v57 }
  0x3d   : > { %v479_v60 = vadd.f32 %v478_v58, %v477_v59 }
  0x3f   : > { %v480_v61 = vpack.c.bf16 %v479_v60, %v479_v60 }
  0x41   : > { %1409 = vmatmul.mubr.msk.bf16.vlgmr.msra.gmra.mrb[0].mxu0 %vm455_vm1, %v480_v61 }
  0x42   : > { %1428 = vmatprep.mubr.msk.bf16.mxu0 %vm455_vm1, %v497_v33  ;;  %1425 = vmatpush3.bf16.msra.mxu0 %v1531_v22 }
  0x43   : > { %1426 = vmatprep.subr.bf16.mxu0 %v1532_v23 }
  0x46   : > { %1427 = vmatpush3.bf16.msra.mxu0 %v1532_v23 }
  0x47   : > { %1448 = vmatprep.subr.bf16.mxu0 %v1619_v2 }
  0x49   : > { %1429 = vmatmul.mubr.msk.bf16.vlgmr.msra.gmra.mrb[4].mxu0 %vm455_vm1, %v1793_v38 }
  0x4a   : > { %1449 = vmatpush3.bf16.msra.mxu0 %v1529_v62  ;;  %1432 = vmatprep.mubr.msk.bf16.mxu0 %vm455_vm1, %v1799_v42 }
  0x4b   : > { %1450 = vmatprep.subr.bf16.mxu0 %v1619_v2 }
  0x4e   : > { %1451 = vmatpush3.bf16.msra.mxu0 %v1530_v63 }
  0x51   : > { %1433 = vmatmul.mubr.msk.bf16.gmra.mrb[8].mxu0 %vm455_vm1, %v1805_v49 }
  0x52   : > { %1452 = vmatprep.mubr.msk.bf16.mxu0 %vm1620_vm0, %v1619_v2 }
  0xf9   : > { %v1418_v1 = vpop.f32.mrb[0].mxu1 }
  0xfa   : > { %v642_v3 = vadd.f32 %v1418_v1, %v1318_v0  ;;  %v633_v4 = vpop.f32.mrb[1].mxu1 }
  0xfb   : > { %v634_v5 = vadd.f32 %v1318_v0, %v633_v4  ;;  %v1419_v6 = vpop.f32.mrb[2].mxu1 }
  0xfc   : > { %v645_v7 = vadd.f32 %v1419_v6, %v1318_v0  ;;  %v636_v8 = vpop.f32.mrb[3].mxu1 }
  0xfd   : > { %v637_v9 = vadd.f32 %v1318_v0, %v636_v8 }
  0xfe   : > { %v665_v10 = vpack.c.bf16 %v645_v7, %v642_v3 }
  0xff   : > { %v664_v11 = vpack.c.bf16 %v637_v9, %v634_v5 }
 0x101   : > { %v1422_v12 = vpop.f32.mrb[4].mxu1 }
 0x102   : > { %v658_v13 = vadd.f32 %v1422_v12, %v1318_v0  ;;  %v649_v14 = vpop.f32.mrb[5].mxu1 }
 0x103   : > { %v650_v15 = vadd.f32 %v1318_v0, %v649_v14  ;;  %v1423_v16 = vpop.f32.mrb[6].mxu1 }
 0x104   : > { %v661_v17 = vadd.f32 %v1423_v16, %v1318_v0  ;;  %v652_v18 = vpop.f32.mrb[7].mxu1 }
 0x105   : > { %v653_v19 = vadd.f32 %v1318_v0, %v652_v18 }
 0x106   : > { %v667_v20 = vpack.c.bf16 %v661_v17, %v658_v13 }
 0x107   : > { %v666_v21 = vpack.c.bf16 %v653_v19, %v650_v15 }
 0x114   : > { %v555_v26 = vpop.f32.mrb[0].mxu0 }
 0x115   : > { %v556_v27 = vadd.f32 %v555_v26, %v505_v25  ;;  %v1410_v28 = vpop.f32.mrb[1].mxu0  ;;  %v764_v26 = vld [vmem:[%s2003_s12] sm:$0x3] }
 0x116   : > { %v558_v30 = vpop.f32.mrb[2].mxu0  ;;  %1480 = vmatprep.subr.msk.bf16.mxu0 %vm1023_vm3, %v764_v26 }
 0x117   : > { %1173 = vrot.lane.b32.xlu1 %v556_v27, %s1621_s5  ;;  %v1411_v31 = vpop.f32.mrb[3].mxu0  ;;  %v561_v32 = vmul.f32 0.35355338, %v556_v27  ;;  %v563_v38 = vpack.c.bf16 %v556_v27, %v556_v27  ;;  %v1025_v27 = vsel %vm1023_vm3, %v764_v26, 0  ;;  %s431_s5 = sand.u32 1, %s1609_s26  }
 0x118   : > { %s432_s23 = scalar_lea.vmem [#allocation2], %s431_s5  ;;  %s1242_s29 = scalar_lea.sflag [#allocation3], %s431_s5 }
 0x119   : > { %v562_v33 = vpack.c.bf16 %v561_v32, %v561_v32  ;;  %s1254_s24 = sshll.u32 %s432_s23, 4  ;;  %s1951_s24 = int_to_ptr.vmem [resolvable:$true] %s1254_s24 }
 0x11a   : > { %s1555_s21 = scalar_lea.vmem %s1951_s24, 16 }
 0x11b   : > { %866 = vrot.lane.b32.xlu0 %v562_v33, %s1622_s17  ;;  %v766_v35 = vpack.i.b16 %v562_v33, %v562_v33  ;;  %p1556_p11 = scmp.ne.s32.totalorder %s1951_s24, %s1555_s21  ;;  %s1559_s17 = sshll.u32 %s1624_s22, 4  ;;  %s1560_s17 = int_to_ptr.vmem [resolvable:$false] %s1559_s17 }
 0x11c   : > { %v1430_v45 = vpop.f32.mrb[4].mxu0  ;;  %p1562_p0 = scmp.lt.s32.totalorder %s1951_s24, %s1560_s17 }
 0x11d   : > { %v771_v36 = vrot.slane %v766_v35, %v1834_v34  ;;  %v1855_v46 = vadd.f32 %v1430_v45, %v1325_v44  ;;  %v725_v47 = vpop.f32.mrb[5].mxu0  ;;  %p1557_p12 = pnand %p1556_p11, %p1733_p5 }
 0x11e   : > { %v1857_v48 = vadd.f32 %v1325_v44, %v725_v47  ;;  %v1431_v49 = vpop.f32.mrb[6].mxu0 }
 0x11f   : > { %v773_v37 = vmul.bf16 %v771_v36, %v665_v10  ;;  %v772_v39 = vmul.bf16 %v771_v36, %v664_v11  ;;  %v774_v40 = vmul.bf16 %v771_v36, %v666_v21  ;;  %v775_v41 = vmul.bf16 %v771_v36, %v667_v20  ;;  %v728_v51 = vpop.f32.mrb[7].mxu0  ;;  %p1558_p13 = pneg %p1557_p12 }
 0x120   : > { %v1859_v50 = vadd.f32 %v1431_v49, %v1325_v44  ;;  %v1861_v52 = vadd.f32 %v1325_v44, %v728_v51 }
 0x121   : > { %1440 = vmatprep.mubr.msk.bf16.mxu1 %vm455_vm1, %v772_v39 }
 0x122   : > { %1441 = vmatmul.mubr.msk.bf16.vlgmr.msra.gmra.mrb[8].mxu1 %vm455_vm1, %v773_v37  ;;  %v757_v53 = vpack.c.bf16 %v1859_v50, %v1855_v46  ;;  %v756_v54 = vpack.c.bf16 %v1861_v52, %v1857_v48 }
 0x123   : > { %1444 = vmatprep.mubr.msk.bf16.mxu1 %vm455_vm1, %v774_v40  ;;  %1467 = vmatpush3.bf16.msra.mxu1 %v1025_v27 }
 0x124   : > { %v1434_v56 = vpop.f32.mrb[8].mxu0  ;;  %1472 = vmatprep.subr.bf16.mxu1 %v1619_v2 }
 0x125   : > { %v1869_v58 = vadd.f32 %v1434_v56, %v1325_v44  ;;  %v741_v59 = vpop.f32.mrb[9].mxu0 }
 0x126   : > { %v1871_v61 = vadd.f32 %v1325_v44, %v741_v59  ;;  %v1435_v62 = vpop.f32.mrb[10].mxu0 }
 0x127   : > { %v1873_v0 = vadd.f32 %v1435_v62, %v1325_v44  ;;  %v744_v1 = vpop.f32.mrb[11].mxu0 }
 0x128   : > { %v1875_v3 = vadd.f32 %v1325_v44, %v744_v1 }
 0x129   : > { %v759_v4 = vpack.c.bf16 %v1873_v0, %v1869_v58 }
 0x12a   : > { %1445 = vmatmul.mubr.msk.bf16.gmra.mrb[12].mxu1 %vm455_vm1, %v775_v41  ;;  %v758_v5 = vpack.c.bf16 %v1875_v3, %v1871_v61 }
 0x12b   : > { %1468 = vmatprep.mubr.msk.bf16.mxu1 %vm1620_vm0, %v1619_v2 }
 0x18d   : > { %v867_v42 = vpop.permute.xlu0 %866 }
 0x18e   : > { %v869_v43 = vmul.bf16 %v867_v42, %v563_v38 }
 0x190   : > { %871 = vrot.lane.b32.xlu0 %v869_v43, %s1623_s3  ;;  %s1561_s3 = scalar_lea.vmem %s1560_s17, 32 }
 0x191   : > { %p1563_p1 = scmp.lt.s32.totalorder %s1561_s3, %s1555_s21 }
 0x193   : > { %p1564_p2 = por %p1563_p1, %p1562_p0 }
 0x195   : > { %p1565_p3 = pnand %p1564_p2, %p1558_p13 }
 0x1f5   : > { %v1867_v55 = vpop.f32.mrb[8].mxu1 }
 0x1f6   : > { %v834_v57 = vpop.f32.mrb[9].mxu1  ;;  %v919_v7 = vsel %vm916_vm2, %v1867_v55, -inf }
 0x1f7   : > { %v1443_v60 = vpop.f32.mrb[10].mxu1  ;;  %v917_v10 = vsel %vm916_vm2, %v834_v57, -inf }
 0x1f8   : > { %v837_v63 = vpop.f32.mrb[11].mxu1  ;;  %v920_v14 = vsel %vm916_vm2, %v1443_v60, -inf }
 0x1f9   : > { %v918_v18 = vsel %vm916_vm2, %v837_v63, -inf }
 0x1fd   : > { %v1446_v6 = vpop.f32.mrb[12].mxu1 }
 0x1fe   : > { %v925_v8 = vsel %vm916_vm2, %v1446_v6, -inf  ;;  %v850_v9 = vpop.f32.mrb[13].mxu1 }
 0x1ff   : > { %v926_v11 = vmax.f32 %v919_v7, %v925_v8  ;;  %v921_v12 = vsel %vm916_vm2, %v850_v9, -inf  ;;  %v1447_v13 = vpop.f32.mrb[14].mxu1 }
 0x200   : > { %v922_v15 = vmax.f32 %v917_v10, %v921_v12  ;;  %v927_v16 = vsel %vm916_vm2, %v1447_v13, -inf  ;;  %v853_v17 = vpop.f32.mrb[15].mxu1 }
 0x201   : > { %v928_v19 = vmax.f32 %v920_v14, %v927_v16  ;;  %v923_v20 = vsel %vm916_vm2, %v853_v17, -inf }
 0x202   : > { %v924_v21 = vmax.f32 %v918_v18, %v923_v20  ;;  %v872_v22 = vpop.permute.xlu0 %871 }
 0x203   : > { %v930_v23 = vmax.f32 %v926_v11, %v928_v19  ;;  %1453 = vmatmul.mubr.msk.bf16.vlgmr.msra.gmra.mrb[12].mxu0 %vm455_vm1, %v872_v22 }
 0x204   : > { %v929_v24 = vmax.f32 %v922_v15, %v924_v21  ;;  %1457 = vmatpush3.bf16.msra.mxu0 %v1025_v27 }
 0x206   : > { %v931_v25 = vmax.f32 %v929_v24, %v930_v23 }
 0x208   : > { %v932_v28 = vrot.slane %v931_v25, 4 }
 0x20a   : > { %v933_v29 = vmax.f32 %v931_v25, %v932_v28 }
 0x20c   : > { %v934_v30 = vrot.slane %v933_v29, 2 }
 0x20e   : > { %v935_v31 = vmax.f32 %v933_v29, %v934_v30 }
 0x210   : > { %v936_v32 = vrot.slane %v935_v31, 1 }
 0x212   : > { %v937_v33 = vmax.f32 %v935_v31, %v936_v32 }
 0x2d6   : > { %v910_v35 = vpop.f32.mrb[12].mxu0 }
 0x2d7   : > { %v938_v36 = vmax.f32 %v937_v33, %v910_v35  ;;  %v1454_v37 = vpop.f32.mrb[13].mxu0 }
 0x2d8   : > { %v913_v39 = vpop.f32.mrb[14].mxu0 }
 0x2d9   : > { %v939_v40 = vsub.f32 %v910_v35, %v938_v36  ;;  %v945_v41 = vrot.slane %v938_v36, %v1834_v34  ;;  %v1455_v38 = vpop.f32.mrb[15].mxu0 }
 0x2db   : > { %v946_v42 = vsub.f32 %v834_v57, %v945_v41  ;;  %v947_v43 = vsub.f32 %v837_v63, %v945_v41  ;;  %v948_v44 = vsub.f32 %v1867_v55, %v945_v41  ;;  %v949_v45 = vsub.f32 %v1443_v60, %v945_v41 }
 0x2dc   : > { %v950_v47 = vsub.f32 %v850_v9, %v945_v41  ;;  %v951_v49 = vsub.f32 %v853_v17, %v945_v41  ;;  %v952_v51 = vsub.f32 %v1446_v6, %v945_v41  ;;  %v953_v56 = vsub.f32 %v1447_v13, %v945_v41 }
 0x2dd   : > { %v954_v59 = vmul.f32 1.442695, %v946_v42  ;;  %v956_v62 = vmul.f32 1.442695, %v947_v43  ;;  %v958_v1 = vmul.f32 1.442695, %v948_v44 }
 0x2de   : > { %v960_v7 = vmul.f32 1.442695, %v949_v45  ;;  %v962_v8 = vmul.f32 1.442695, %v950_v47  ;;  %v964_v10 = vmul.f32 1.442695, %v951_v49 }
 0x2df   : > { %1535 = vpow2.f32 %v954_v59  ;;  %v966_v57 = vmul.f32 1.442695, %v952_v51  ;;  %v968_v63 = vmul.f32 1.442695, %v953_v56  ;;  %v940_v28 = vmul.f32 1.442695, %v939_v40 }
 0x2e0   : > { %1537 = vpow2.f32 %v956_v62 }
 0x2e1   : > { %1539 = vpow2.f32 %v958_v1 }
 0x2e2   : > { %1541 = vpow2.f32 %v960_v7 }
 0x2e3   : > { %1543 = vpow2.f32 %v962_v8 }
 0x2e4   : > { %1545 = vpow2.f32 %v964_v10  ;;  %v1533_v10 = vld [vmem:[%s2000_s9] sm:$0xff]  }
 0x2e5   : > { %1547 = vpow2.f32 %v966_v57  ;;  %v1534_v57 = vld [vmem:[%s2000_s9 + $0x8] sm:$0xff]  }
 0x2e6   : > { %1549 = vpow2.f32 %v968_v63 }
 0x2e7   : > { %1551 = vpow2.f32 %v940_v28 }
 0x2e9   : > { %v1536_v55 = vpop.eup %1535 }
 0x2ea   : > { %v1538_v60 = vpop.eup %1537  ;;  %v970_v6 = vsel %vm916_vm2, %v1536_v55, 0.0 }
 0x2eb   : > { %v1540_v9 = vpop.eup %1539  ;;  %v971_v11 = vsel %vm916_vm2, %v1538_v60, 0.0 }
 0x2ec   : > { %v1542_v12 = vpop.eup %1541  ;;  %v972_v13 = vadd.f32 %v971_v11, %v970_v6  ;;  %v973_v14 = vsel %vm916_vm2, %v1540_v9, 0.0 }
 0x2ed   : > { %v1544_v15 = vpop.eup %1543  ;;  %v975_v17 = vsel %vm916_vm2, %v1542_v12, 0.0 }
 0x2ee   : > { %v974_v16 = vadd.f32 %v973_v14, %v972_v13  ;;  %v1546_v18 = vpop.eup %1545  ;;  %v977_v20 = vsel %vm916_vm2, %v1544_v15, 0.0 }
 0x2ef   : > { %v1548_v21 = vpop.eup %1547  ;;  %v979_v23 = vsel %vm916_vm2, %v1546_v18, 0.0 }
 0x2f0   : > { %v976_v19 = vadd.f32 %v975_v17, %v974_v16  ;;  %v1550_v24 = vpop.eup %1549  ;;  %v981_v26 = vsel %vm916_vm2, %v1548_v21, 0.0 }
 0x2f1   : > { %v983_v29 = vsel %vm916_vm2, %v1550_v24, 0.0  ;;  %v1552_v39 = vpop.eup %1551 }
 0x2f2   : > { %v978_v22 = vadd.f32 %v977_v20, %v976_v19 }
 0x2f4   : > { %v980_v25 = vadd.f32 %v979_v23, %v978_v22 }
 0x2f6   : > { %v982_v27 = vadd.f32 %v981_v26, %v980_v25 }
 0x2f8   : > { %v984_v30 = vadd.f32 %v983_v29, %v982_v27 }
 0x2fa   : > { %v985_v31 = vrot.slane %v984_v30, 4 }
 0x2fc   : > { %v986_v32 = vadd.f32 %v985_v31, %v984_v30 }
 0x2fe   : > { %v987_v33 = vrot.slane %v986_v32, 2 }
 0x300   : > { %v988_v35 = vadd.f32 %v987_v33, %v986_v32 }
 0x302   : > { %v989_v36 = vrot.slane %v988_v35, 1 }
 0x304   : > { %v990_v37 = vadd.f32 %v989_v36, %v988_v35 }
 0x306   : > { %v991_v41 = vadd.f32 %v1552_v39, %v990_v37 }
 0x308   : > { %1553 = vrcp.f32 %v991_v41 }
 0x312   : > { %v1554_v38 = vpop.eup %1553 }
 0x313   : > { %v996_v42 = vrot.slane %v1554_v38, %v1834_v34  ;;  %v1009_v43 = vmul.f32 %v1554_v38, %v1552_v39 }
 0x315   : > { %v1010_v44 = vpack.c.bf16 %v1009_v43, %v1009_v43  ;;  %v997_v45 = vmul.f32 %v1536_v55, %v996_v42  ;;  %v998_v40 = vmul.f32 %v1538_v60, %v996_v42  ;;  %v999_v47 = vmul.f32 %v1540_v9, %v996_v42  ;;  %v1174_v43 = vpop.permute.xlu1 %1173 }
 0x316   : > { %v1000_v49 = vmul.f32 %v1542_v12, %v996_v42  ;;  %v1001_v51 = vmul.f32 %v1544_v15, %v996_v42  ;;  %v1002_v56 = vmul.f32 %v1546_v18, %v996_v42  ;;  %v1003_v59 = vmul.f32 %v1548_v21, %v996_v42 }
 0x317   : > { %1469 = vmatmul.mubr.msk.bf16.vlgmr.msra.gmra.mrb[16].mxu1 %vm916_vm2, %v1010_v44  ;;  %v1005_v62 = vpack.c.bf16 %v998_v40, %v997_v45  ;;  %v1004_v1 = vmul.f32 %v1550_v24, %v996_v42 }
 0x318   : > { %v1006_v7 = vpack.c.bf16 %v1000_v49, %v999_v47  ;;  %v1007_v8 = vpack.c.bf16 %v1002_v56, %v1001_v51  ;;  %1476 = vmatprep.mubr.msk.bf16.mxu1 %vm1620_vm0, %v1619_v2  ;;  %1473 = vmatpush3.bf16.msra.mxu1 %v1533_v10  ;;  %v1183_v49 = vld [vmem:[%s2001_s10] sm:$0x1] }
 0x319   : > { %1458 = vmatprep.mubr.msk.bf16.mxu0 %vm916_vm2, %v1005_v62  ;;  %v1008_v34 = vpack.c.bf16 %v1004_v1, %v1003_v59  ;;  %1474 = vmatprep.subr.bf16.mxu1 %v1619_v2 }
 0x31a   : > { %1459 = vmatmul.mubr.msk.bf16.vlgmr.msra.gmra.mrb[16].mxu0 %vm916_vm2, %v1006_v7 }
 0x31b   : > { %1462 = vmatprep.mubr.msk.bf16.mxu0 %vm916_vm2, %v1007_v8 }
 0x31c   : > { %1475 = vmatpush3.bf16.msra.mxu1 %v1534_v57 }
 0x322   : > { %1463 = vmatmul.mubr.msk.bf16.gmra.mrb[20].mxu0 %vm916_vm2, %v1008_v34 }
 0x3ea   : > { %v1133_v63 = vpop.f32.mrb[16].mxu1 }
 0x3eb   : > { %v1470_v55 = vpop.f32.mrb[17].mxu1  ;;  %v1176_v44 = vmul.f32 %v1174_v43, %v1133_v63 }
 0x3ec   : > { %v1136_v60 = vpop.f32.mrb[18].mxu1 }
 0x3ed   : > { %v1460_v6 = vpop.f32.mrb[16].mxu0  ;;  %v1471_v9 = vpop.f32.mrb[19].mxu1 }
 0x3ee   : > { %v1061_v11 = vpop.f32.mrb[17].mxu0 }
 0x3ef   : > { %v1461_v12 = vpop.f32.mrb[18].mxu0 }
 0x3f0   : > { %v1093_v13 = vpack.c.bf16 %v1461_v12, %v1460_v6  ;;  %v1064_v14 = vpop.f32.mrb[19].mxu0 }
 0x3f1   : > { %v1092_v15 = vpack.c.bf16 %v1064_v14, %v1061_v11 }
 0x3f2   : > { %v1140_v16 = vmul.bf16 %v1093_v13, %v757_v53 }
 0x3f3   : > { %v1139_v17 = vmul.bf16 %v1092_v15, %v756_v54 }
 0x3f4   : > { %v1145_v2 = vunpack.c.l.bf16 %v1140_v16  ;;  %v1146_v22 = vunpack.c.h.bf16 %v1140_v16 }
 0x3f5   : > { %v1143_v18 = vunpack.c.l.bf16 %v1139_v17  ;;  %v1144_v19 = vunpack.c.h.bf16 %v1139_v17  ;;  %v1464_v20 = vpop.f32.mrb[20].mxu0 }
 0x3f6   : > { %v1077_v21 = vpop.f32.mrb[21].mxu0  ;;  %v1154_v46 = vsel %vm455_vm1, %v1145_v2, 0.0  ;;  %v1156_v52 = vsel %vm455_vm1, %v1146_v22, 0.0 }
 0x3f7   : > { %v1151_v23 = vsel %vm455_vm1, %v1143_v18, 0.0  ;;  %v1152_v24 = vsel %vm455_vm1, %v1144_v19, 0.0  ;;  %v1465_v25 = vpop.f32.mrb[22].mxu0 }
 0x3f8   : > { %v1153_v26 = vadd.f32 %v1152_v24, %v1151_v23  ;;  %v1095_v27 = vpack.c.bf16 %v1465_v25, %v1464_v20  ;;  %v1080_v28 = vpop.f32.mrb[23].mxu0 }
 0x3f9   : > { %v1094_v50 = vpack.c.bf16 %v1080_v28, %v1077_v21 }
 0x3fa   : > { %v1155_v53 = vadd.f32 %v1154_v46, %v1153_v26  ;;  %v1142_v48 = vmul.bf16 %v1095_v27, %v759_v4 }
 0x3fb   : > { %v1141_v54 = vmul.bf16 %v1094_v50, %v758_v5 }
 0x3fc   : > { %v1157_v29 = vadd.f32 %v1156_v52, %v1155_v53  ;;  %v1149_v32 = vunpack.c.l.bf16 %v1142_v48  ;;  %v1150_v36 = vunpack.c.h.bf16 %v1142_v48 }
 0x3fd   : > { %v1147_v30 = vunpack.c.l.bf16 %v1141_v54  ;;  %v1148_v31 = vunpack.c.h.bf16 %v1141_v54 }
 0x3fe   : > { %v1162_v58 = vsel %vm455_vm1, %v1149_v32, 0.0  ;;  %v1164_v4 = vsel %vm455_vm1, %v1150_v36, 0.0 }
 0x3ff   : > { %v1158_v33 = vsel %vm455_vm1, %v1147_v30, 0.0  ;;  %v1160_v37 = vsel %vm455_vm1, %v1148_v31, 0.0 }
 0x400   : > { %v1159_v35 = vadd.f32 %v1158_v33, %v1157_v29 }
 0x402   : > { %v1161_v39 = vadd.f32 %v1160_v37, %v1159_v35 }
 0x404   : > { %v1163_v0 = vadd.f32 %v1162_v58, %v1161_v39 }
 0x406   : > { %v1165_v61 = vadd.f32 %v1164_v4, %v1163_v0 }
 0x408   : > { %v1166_v3 = vrot.slane %v1165_v61, 4 }
 0x40a   : > { %v1167_v5 = vadd.f32 %v1166_v3, %v1165_v61 }
 0x40c   : > { %v1168_v41 = vrot.slane %v1167_v5, 2 }
 0x40e   : > { %v1169_v38 = vadd.f32 %v1168_v41, %v1167_v5 }
 0x410   : > { %v1170_v42 = vrot.slane %v1169_v38, 1 }
 0x412   : > { %v1171_v45 = vadd.f32 %v1170_v42, %v1169_v38 }
 0x414   : > { %v1177_v40 = vadd.f32 %v1176_v44, %v1171_v45 }
 0x416   : > { %v1178_v47 = vpack.c.bf16 %v1177_v40, %v1177_v40 }
 0x418   : > { %1477 = vmatmul.mubr.msk.bf16.vlgmr.msra.gmra.mrb[20].mxu1 %vm455_vm1, %v1178_v47 }
 0x4eb   : > { %v1233_v51 = vpop.f32.mrb[20].mxu1 }
 0x4ec   : > { %v1234_v56 = vadd.f32 %v1233_v51, %v1183_v49  ;;  %v1478_v59 = vpop.f32.mrb[21].mxu1 }
 0x4ed   : > { %v1236_v62 = vpop.f32.mrb[22].mxu1 }
 0x4ee   : > { %v1479_v1 = vpop.f32.mrb[23].mxu1  ;;  %1240 = vst.msk [vmem:[%s432_s23] sm:$0x1] %vm1239_vm4, %v1234_v56 }
 0x4ef   : > { %1568 = shalt.err (!%p1565_p3)
}
 0x4f0   : > { %s1569_s5 = scalar_lea.hbm %s1949_s20, 16  ;;  %s1573_s30 = scalar_lea.hbm %s2004_s13, 32 }
 0x4f1   : > { %p1570_p4 = scmp.ne.s32.totalorder %s1949_s20, %s1569_s5  ;;  %p1574_p9 = scmp.lt.u32.totalorder %s1949_s20, %s2004_s13 }
 0x4f2   : > { %p1575_p10 = scmp.lt.u32.totalorder %s1573_s30, %s1569_s5  ;;  %p1577_p12 = scmp.lt.u32.totalorder %s1569_s5, %s1949_s20 }
 0x4f3   : > { %p1571_p7 = pnand %p1570_p4, %p1733_p5 }
 0x4f4   : > { %p1576_p11 = por %p1575_p10, %p1574_p9 }
 0x4f5   : > { %p1572_p8 = pneg %p1571_p7 }
 0x4f6   : > { %p1578_p13 = por %p1577_p12, %p1576_p11 }
 0x4f8   : > { %p1579_p0 = pnand %p1578_p13, %p1572_p8 }
 0x4fa   : > { %1582 = shalt.err (!%p1579_p0)
}
 0x4fb   : > { %1481 = dma.vmem_to_hbm [thread:$0]  (%p1733_p5), %s1951_s24, 16, %s1949_s20, %s1242_s29  }
 0x4fc PF: > { %p1487_p1 = scmp.ge.s32.totalorder %s1617_s28, 2  ;;  %s1266_s21 = sand.u32 1, %s1605_s25  }
 0x4fd   : > { %s1267_s17 = scalar_lea.sflag [#allocation3], %s1266_s21 }
 0x4fe   : > { %p1484_p2 = pnand %p1487_p1, %p1737_p6 }
 0x500   : > { %1600 = dma.done.wait (!%p1484_p2), %s1267_s17, 16  }
 0x501   : > { %1602 = vsyncadd (!%p1484_p2), %s1267_s17, 4294967280  ;;  %s2012_s3 = sld [smem:[#allocation5_spill]]  ;;  %p23_p3 = scmp.ge.s32.totalorder %s1720_s14, 4  }
 0x502   : > { %s2013_s25 = smov %s1609_s26  ;;  %s2014_s26 = smov %s1613_s27 }
 0x503   : > { %s2016_s28 = smov %s1720_s14  ;;  %25 = sbr.rel (!%p23_p3) target bundleno = 6 (0x6), region = 107 }
 0x507   : > { %s2015_s27 = smov %s2012_s3 }
 0x50a   :  { %1271 = vsyncpa [#allocation3], 1 }
 0x50b   :  { %1273 = vsyncpa [#allocation3 + $0x1], 1 }

// kernel: attention_pool_2d.1
= control target key start
LH: loop header
LB: loop body
LE: loop exit
PB: predicated region body
PF: predicated region fallthrough
CT: control target
= control target key end

     0   :  { %s1991_s0 = inlined_call_operand.vmem [shape: bf16[2,64,32], index: 0, kind: input, shape index: {}]   ;;  %s1992_s1 = inlined_call_operand.vmem [shape: f32[1,32], index: 1, kind: input, shape index: {}]   ;;  %s1993_s2 = inlined_call_operand.vmem [shape: f32[64,32], index: 2, kind: input, shape index: {}]   ;;  %s1994_s3 = inlined_call_operand.vmem [shape: bf16[32,96], index: 3, kind: input, shape index: {}]   ;;  %s1995_s4 = inlined_call_operand.vmem [shape: f32[1,96], index: 4, kind: input, shape index: {}]   ;;  %s1996_s5 = inlined_call_operand.vmem [shape: bf16[32,32], index: 5, kind: input, shape index: {}]   ;;  %s1997_s6 = inlined_call_operand.vmem [shape: f32[1,32], index: 6, kind: input, shape index: {}]   ;;  %s1998_s7 = inlined_call_operand.vmem [shape: bf16[32,32], index: 7, kind: input, shape index: {}]   ;;  %s1999_s8 = inlined_call_operand.vmem [shape: f32[1,32], index: 8, kind: input, shape index: {}]   ;;  %s2000_s9 = inlined_call_operand.vmem [shape: bf16[32,16], index: 9, kind: input, shape index: {}]   ;;  %s2001_s10 = inlined_call_operand.vmem [shape: f32[1,16], index: 10, kind: input, shape index: {}]   ;;  %s2002_s11 = inlined_call_operand.vmem [shape: bf16[32,4], index: 11, kind: input, shape index: {}]   ;;  %s2003_s12 = inlined_call_operand.vmem [shape: bf16[4,32], index: 12, kind: input, shape index: {}]   ;;  %s2004_s13 = inlined_call_operand.hbm [shape: f32[2,1,16], index: 13, kind: output, shape index: {}]  }
   0x1   :  { %2005 = sst [smem:[#allocation6_spill]] %s1994_s3 }
   0x2   :  { %2006 = sst [smem:[#allocation7_spill]] %s1996_s5 }
   0x3   :  { %18 = vsyncpa [#allocation3], 0 }
   0x4   :  { %20 = vsyncpa [#allocation3 + $0x1], 0  ;;  %s1695_s25 = smov 0   ;;  %s1697_s26 = smov 0  }
   0x5   :  { %s1699_s27 = smov 0   ;;  %s1701_s28 = smov 0  }
   0x6 LB: > { %s1716_s29 = sadd.s32 4294967295, %s1617_s28   ;;  %s1309_s30 = sadd.s32 4294967294, %s1617_s28   ;;  %s1617_s28 = sphi %s1701_s28, %s2016_s28   ;;  %s1613_s27 = sphi %s1699_s27, %s2015_s27   ;;  %s1609_s26 = sphi %s1697_s26, %s2014_s26   ;;  %s1605_s25 = sphi %s1695_s25, %s2013_s25  }
   0x7   : > { %s1720_s14 = sadd.s32 1, %s1617_s28   ;;  %s311_s15 = sadd.s32 1, %s1613_s27 }
   0x8   : > { %s308_s16 = ssub.s32 %s1617_s28, %s1720_s14  ;;  %p321_p0 = scmp.ne.s32.totalorder %s1613_s27, %s1609_s26 }
   0x9   : > { %p309_p1 = scmp.eq.s32.totalorder %s308_s16, 0  ;;  %p322_p2 = scmp.eq.s32.totalorder %s1716_s29, 1 }
   0xa   : > { %p327_p3 = scmp.ne.s32.totalorder %s1609_s26, %s1605_s25  ;;  %p328_p4 = scmp.eq.s32.totalorder %s1309_s30, 1 }
   0xb   : > { %s1731_s17 = scalar_select %p309_p1, %s1613_s27, %s311_s15  }
   0xc   : > { %p1733_p5 = por %p322_p2, %p321_p0  ;;  %p1737_p6 = por %p328_p4, %p327_p3 }
   0xd   : > { %2007 = sst [smem:[#allocation5_spill]] %s1731_s17  ;;  %p1312_p7 = scmp.ge.s32.totalorder %s1617_s28, 1 }
   0xe   : > { %p390_p8 = scmp.lt.s32.totalorder %s1617_s28, 3 }
  0x10   : > { %p391_p9 = pnand %p1312_p7, %p390_p8 }
  0x11   : > { %s2010_s5 = sld [smem:[#allocation7_spill]] (!%p391_p9)  ;;  %v1619_v2 = vmov (!%p391_p9), 0.0   ;;  %p433_p10 = scmp.lt.s32.totalorder (!%p391_p9), %s1716_s29, 1  ;;  %vm1620_vm0 = vmmov (!%p391_p9), 0   ;;  %v481_v5 = vld [vmem:[%s1993_s2] sm:$0xff] (!%p391_p9)  ;;  %v482_v6 = vld [vmem:[%s1993_s2 + $0x8] sm:$0xff] (!%p391_p9) }
  0x12   : > { %394 = sbr.rel (%p391_p9) target bundleno = 1276 (0x4fc), region = 72  ;;  %1404 = vmatprep.subr.bf16.mxu0 (!%p391_p9), %v1619_v2  ;;  %s2011_s3 = sld [smem:[#allocation6_spill]] (!%p391_p9)  ;;  %1408 = vmatprep.mubr.msk.bf16.mxu0 (!%p391_p9), %vm1620_vm0, %v1619_v2  ;;  %vm455_vm1 = vcmask (!%p391_p9), 261120   ;;  %v483_v10 = vld [vmem:[%s1993_s2 + $0x10] sm:$0xff] (!%p391_p9)  ;;  %v484_v11 = vld [vmem:[%s1993_s2 + $0x18] sm:$0xff] (!%p391_p9)  ;;  %v485_v15 = vld [vmem:[%s1993_s2 + $0x20] sm:$0xff] (!%p391_p9) }
  0x13   : > { %v486_v25 = vld [vmem:[%s1993_s2 + $0x28] sm:$0xff] (!%p391_p9)  ;;  %v487_v30 = vld [vmem:[%s1993_s2 + $0x30] sm:$0xff] (!%p391_p9)  ;;  %v488_v35 = vld [vmem:[%s1993_s2 + $0x38] sm:$0xff] (!%p391_p9)  ;;  %s1622_s17 = smov (!%p391_p9), 32   ;;  %vm916_vm2 = vcmask (!%p391_p9), 31744   ;;  %vm1023_vm3 = vcmask (!%p391_p9), 1041408  }
  0x14   : > { %v478_v58 = vld [vmem:[%s1992_s1] sm:$0x1] (!%p391_p9)  ;;  %v1530_v63 = vld [vmem:[%s2002_s11 + $0x8] sm:$0xff] (!%p391_p9)   ;;  %vm1239_vm4 = vcmask (!%p391_p9), 122880   ;;  %s1624_s22 = smov (!%p391_p9), [#allocation2]  }
  0x15   : > { %v1529_v62 = vld [vmem:[%s2002_s11] sm:$0xff] (!%p391_p9)  }
  0x17   : > { %v1525_v0 = vld [vmem:[%s2010_s5] sm:$0xff] (!%p391_p9)   ;;  %v1526_v1 = vld [vmem:[%s2010_s5 + $0x8] sm:$0xff] (!%p391_p9)   ;;  %s1621_s5 = smov (!%p391_p9), 64  }
  0x18   : > { %1412 = vmatprep.subr.bf16.mxu1 (!%p391_p9), %v1525_v0  ;;  %v1527_v3 = vld [vmem:[%s2011_s3] sm:$0xff] (!%p391_p9)   ;;  %v1528_v4 = vld [vmem:[%s2011_s3 + $0x8] sm:$0xff] (!%p391_p9)   ;;  %s1623_s3 = smov (!%p391_p9), 96  }
  0x19   : > { %1413 = vmatpush3.bf16.msra.mxu1 %v1525_v0  ;;  %s434_s15 = scalar_select %p433_p10, %s1716_s29, 1  ;;  %1405 = vmatpush3.bf16.msra.mxu0 %v1527_v3  ;;  %v1318_v0 = vld [vmem:[%s1997_s6] ss:$0 sm:$0xff] }
  0x1a   : > { %1414 = vmatprep.subr.bf16.mxu1 %v1526_v1  ;;  %1406 = vmatprep.subr.bf16.mxu0 %v1619_v2 }
  0x1b   : > { %s1350_s16 = sshll.u32 %s434_s15, 5 }
  0x1c   : > { %s437_s24 = scalar_lea.vmem %s1991_s0, %s1350_s16  ;;  %s1347_s16 = sshll.u32 %s1716_s29, 4 }
  0x1d   : > { %1415 = vmatpush3.bf16.msra.mxu1 %v1526_v1  ;;  %v1352_v7 = vld [vmem:[%s437_s24] sm:$0xff]   ;;  %v1367_v8 = vld [vmem:[%s437_s24 + $0x8] sm:$0xff]   ;;  %v1368_v9 = vld [vmem:[%s437_s24 + $0x10] sm:$0xff]   ;;  %1407 = vmatpush3.bf16.msra.mxu0 %v1528_v4  ;;  %s1949_s20 = scalar_lea.hbm %s2004_s13, %s1347_s16 }
  0x1e   : > { %v1353_v12 = vunpack.c.l.bf16 %v1352_v7  ;;  %v1354_v13 = vunpack.c.h.bf16 %v1352_v7  ;;  %v1357_v14 = vunpack.c.l.bf16 %v1367_v8  ;;  %v1361_v16 = vunpack.c.l.bf16 %v1368_v9  ;;  %v1369_v18 = vld [vmem:[%s437_s24 + $0x18] sm:$0xff]   ;;  %1436 = vmatprep.subr.bf16.mxu1 %v1529_v62 }
  0x1f   : > { %v1358_v17 = vunpack.c.h.bf16 %v1367_v8  ;;  %v1362_v26 = vunpack.c.h.bf16 %v1368_v9  ;;  %v1365_v31 = vunpack.c.l.bf16 %v1369_v18  ;;  %v1366_v36 = vunpack.c.h.bf16 %v1369_v18 }
  0x20   : > { %v456_v19 = vsel %vm455_vm1, %v1353_v12, 0.0  ;;  %v457_v20 = vsel %vm455_vm1, %v1354_v13, 0.0  ;;  %v459_v21 = vsel %vm455_vm1, %v1357_v14, 0.0  ;;  %v489_v22 = vadd.f32 %v1353_v12, %v481_v5 }
  0x21   : > { %v458_v23 = vadd.f32 %v457_v20, %v456_v19  ;;  %v490_v24 = vadd.f32 %v1354_v13, %v482_v6  ;;  %v461_v27 = vsel %vm455_vm1, %v1358_v17, 0.0  ;;  %v491_v28 = vadd.f32 %v1357_v14, %v483_v10 }
  0x22   : > { %v492_v29 = vadd.f32 %v1358_v17, %v484_v11  ;;  %v493_v34 = vadd.f32 %v1361_v16, %v485_v15  ;;  %v463_v37 = vsel %vm455_vm1, %v1361_v16, 0.0  ;;  %v494_v39 = vadd.f32 %v1362_v26, %v486_v25  ;;  %v505_v25 = vld [vmem:[%s1995_s4] sm:$0x1] }
  0x23   : > { %v460_v32 = vadd.f32 %v459_v21, %v458_v23  ;;  %v497_v33 = vpack.c.bf16 %v490_v24, %v489_v22  ;;  %v465_v41 = vsel %vm455_vm1, %v1362_v26, 0.0  ;;  %v495_v43 = vadd.f32 %v1365_v31, %v487_v30  ;;  %v1531_v22 = vld [vmem:[%s1998_s7] sm:$0xff]   ;;  %v1532_v23 = vld [vmem:[%s1998_s7 + $0x8] sm:$0xff]  }
  0x24   : > { %v1793_v38 = vpack.c.bf16 %v492_v29, %v491_v28  ;;  %v1799_v42 = vpack.c.bf16 %v494_v39, %v493_v34  ;;  %v496_v44 = vadd.f32 %v1366_v36, %v488_v35  ;;  %v467_v46 = vsel %vm455_vm1, %v1365_v31, 0.0  ;;  %1424 = vmatprep.subr.bf16.mxu0 %v1531_v22 }
  0x25   : > { %1416 = vmatprep.mubr.msk.bf16.mxu1 %vm455_vm1, %v497_v33  ;;  %v462_v40 = vadd.f32 %v461_v27, %v460_v32  ;;  %v469_v48 = vsel %vm455_vm1, %v1366_v36, 0.0  ;;  %v768_v24 = vlaneseq }
  0x26   : > { %1417 = vmatmul.mubr.msk.bf16.vlgmr.msra.gmra.mrb[0].mxu1 %vm455_vm1, %v1793_v38  ;;  %v1805_v49 = vpack.c.bf16 %v496_v44, %v495_v43  ;;  %v1325_v44 = vld [vmem:[%s1999_s8] ss:$0 sm:$0xff] }
  0x27   : > { %v464_v45 = vadd.f32 %v463_v37, %v462_v40  ;;  %1420 = vmatprep.mubr.msk.bf16.mxu1 %vm455_vm1, %v1799_v42  ;;  %1437 = vmatpush3.bf16.msra.mxu1 %v1529_v62  ;;  %v769_v29 = vshrl.u32 %v768_v24, 7 }
  0x28   : > { %1438 = vmatprep.subr.bf16.mxu1 %v1530_v63 }
  0x29   : > { %v466_v47 = vadd.f32 %v465_v41, %v464_v45  ;;  %v1834_v34 = vsub.s32 0, %v769_v29 }
  0x2b   : > { %v468_v50 = vadd.f32 %v467_v46, %v466_v47  ;;  %1439 = vmatpush3.bf16.msra.mxu1 %v1530_v63 }
  0x2c   : > { %1466 = vmatprep.subr.bf16.mxu1 %v1619_v2 }
  0x2d   : > { %v470_v51 = vadd.f32 %v469_v48, %v468_v50 }
  0x2e   : > { %1421 = vmatmul.mubr.msk.bf16.gmra.mrb[4].mxu1 %vm455_vm1, %v1805_v49 }
  0x2f   : > { %v471_v52 = vrot.slane %v470_v51, 4 }
  0x31   : > { %v472_v53 = vadd.f32 %v471_v52, %v470_v51 }
  0x33   : > { %v473_v54 = vrot.slane %v472_v53, 2 }
  0x35   : > { %v474_v55 = vadd.f32 %v473_v54, %v472_v53 }
  0x37   : > { %v475_v56 = vrot.slane %v474_v55, 1 }
  0x39   : > { %v476_v57 = vadd.f32 %v475_v56, %v474_v55 }
  0x3b   : > { %v477_v59 = vmul.f32 0.015625, %v476_v57 }
  0x3d   : > { %v479_v60 = vadd.f32 %v478_v58, %v477_v59 }
  0x3f   : > { %v480_v61 = vpack.c.bf16 %v479_v60, %v479_v60 }
  0x41   : > { %1409 = vmatmul.mubr.msk.bf16.vlgmr.msra.gmra.mrb[0].mxu0 %vm455_vm1, %v480_v61 }
  0x42   : > { %1428 = vmatprep.mubr.msk.bf16.mxu0 %vm455_vm1, %v497_v33  ;;  %1425 = vmatpush3.bf16.msra.mxu0 %v1531_v22 }
  0x43   : > { %1426 = vmatprep.subr.bf16.mxu0 %v1532_v23 }
  0x46   : > { %1427 = vmatpush3.bf16.msra.mxu0 %v1532_v23 }
  0x47   : > { %1448 = vmatprep.subr.bf16.mxu0 %v1619_v2 }
  0x49   : > { %1429 = vmatmul.mubr.msk.bf16.vlgmr.msra.gmra.mrb[4].mxu0 %vm455_vm1, %v1793_v38 }
  0x4a   : > { %1449 = vmatpush3.bf16.msra.mxu0 %v1529_v62  ;;  %1432 = vmatprep.mubr.msk.bf16.mxu0 %vm455_vm1, %v1799_v42 }
  0x4b   : > { %1450 = vmatprep.subr.bf16.mxu0 %v1619_v2 }
  0x4e   : > { %1451 = vmatpush3.bf16.msra.mxu0 %v1530_v63 }
  0x51   : > { %1433 = vmatmul.mubr.msk.bf16.gmra.mrb[8].mxu0 %vm455_vm1, %v1805_v49 }
  0x52   : > { %1452 = vmatprep.mubr.msk.bf16.mxu0 %vm1620_vm0, %v1619_v2 }
  0xf9   : > { %v1418_v1 = vpop.f32.mrb[0].mxu1 }
  0xfa   : > { %v642_v3 = vadd.f32 %v1418_v1, %v1318_v0  ;;  %v633_v4 = vpop.f32.mrb[1].mxu1 }
  0xfb   : > { %v634_v5 = vadd.f32 %v1318_v0, %v633_v4  ;;  %v1419_v6 = vpop.f32.mrb[2].mxu1 }
  0xfc   : > { %v645_v7 = vadd.f32 %v1419_v6, %v1318_v0  ;;  %v636_v8 = vpop.f32.mrb[3].mxu1 }
  0xfd   : > { %v637_v9 = vadd.f32 %v1318_v0, %v636_v8 }
  0xfe   : > { %v665_v10 = vpack.c.bf16 %v645_v7, %v642_v3 }
  0xff   : > { %v664_v11 = vpack.c.bf16 %v637_v9, %v634_v5 }
 0x101   : > { %v1422_v12 = vpop.f32.mrb[4].mxu1 }
 0x102   : > { %v658_v13 = vadd.f32 %v1422_v12, %v1318_v0  ;;  %v649_v14 = vpop.f32.mrb[5].mxu1 }
 0x103   : > { %v650_v15 = vadd.f32 %v1318_v0, %v649_v14  ;;  %v1423_v16 = vpop.f32.mrb[6].mxu1 }
 0x104   : > { %v661_v17 = vadd.f32 %v1423_v16, %v1318_v0  ;;  %v652_v18 = vpop.f32.mrb[7].mxu1 }
 0x105   : > { %v653_v19 = vadd.f32 %v1318_v0, %v652_v18 }
 0x106   : > { %v667_v20 = vpack.c.bf16 %v661_v17, %v658_v13 }
 0x107   : > { %v666_v21 = vpack.c.bf16 %v653_v19, %v650_v15 }
 0x114   : > { %v555_v26 = vpop.f32.mrb[0].mxu0 }
 0x115   : > { %v556_v27 = vadd.f32 %v555_v26, %v505_v25  ;;  %v1410_v28 = vpop.f32.mrb[1].mxu0  ;;  %v764_v26 = vld [vmem:[%s2003_s12] sm:$0x3] }
 0x116   : > { %v558_v30 = vpop.f32.mrb[2].mxu0  ;;  %1480 = vmatprep.subr.msk.bf16.mxu0 %vm1023_vm3, %v764_v26 }
 0x117   : > { %1173 = vrot.lane.b32.xlu1 %v556_v27, %s1621_s5  ;;  %v1411_v31 = vpop.f32.mrb[3].mxu0  ;;  %v561_v32 = vmul.f32 0.35355338, %v556_v27  ;;  %v563_v38 = vpack.c.bf16 %v556_v27, %v556_v27  ;;  %v1025_v27 = vsel %vm1023_vm3, %v764_v26, 0  ;;  %s431_s5 = sand.u32 1, %s1609_s26  }
 0x118   : > { %s432_s23 = scalar_lea.vmem [#allocation2], %s431_s5  ;;  %s1242_s29 = scalar_lea.sflag [#allocation3], %s431_s5 }
 0x119   : > { %v562_v33 = vpack.c.bf16 %v561_v32, %v561_v32  ;;  %s1254_s24 = sshll.u32 %s432_s23, 4  ;;  %s1951_s24 = int_to_ptr.vmem [resolvable:$true] %s1254_s24 }
 0x11a   : > { %s1555_s21 = scalar_lea.vmem %s1951_s24, 16 }
 0x11b   : > { %866 = vrot.lane.b32.xlu0 %v562_v33, %s1622_s17  ;;  %v766_v35 = vpack.i.b16 %v562_v33, %v562_v33  ;;  %p1556_p11 = scmp.ne.s32.totalorder %s1951_s24, %s1555_s21  ;;  %s1559_s17 = sshll.u32 %s1624_s22, 4  ;;  %s1560_s17 = int_to_ptr.vmem [resolvable:$false] %s1559_s17 }
 0x11c   : > { %v1430_v45 = vpop.f32.mrb[4].mxu0  ;;  %p1562_p0 = scmp.lt.s32.totalorder %s1951_s24, %s1560_s17 }
 0x11d   : > { %v771_v36 = vrot.slane %v766_v35, %v1834_v34  ;;  %v1855_v46 = vadd.f32 %v1430_v45, %v1325_v44  ;;  %v725_v47 = vpop.f32.mrb[5].mxu0  ;;  %p1557_p12 = pnand %p1556_p11, %p1733_p5 }
 0x11e   : > { %v1857_v48 = vadd.f32 %v1325_v44, %v725_v47  ;;  %v1431_v49 = vpop.f32.mrb[6].mxu0 }
 0x11f   : > { %v773_v37 = vmul.bf16 %v771_v36, %v665_v10  ;;  %v772_v39 = vmul.bf16 %v771_v36, %v664_v11  ;;  %v774_v40 = vmul.bf16 %v771_v36, %v666_v21  ;;  %v775_v41 = vmul.bf16 %v771_v36, %v667_v20  ;;  %v728_v51 = vpop.f32.mrb[7].mxu0  ;;  %p1558_p13 = pneg %p1557_p12 }
 0x120   : > { %v1859_v50 = vadd.f32 %v1431_v49, %v1325_v44  ;;  %v1861_v52 = vadd.f32 %v1325_v44, %v728_v51 }
 0x121   : > { %1440 = vmatprep.mubr.msk.bf16.mxu1 %vm455_vm1, %v772_v39 }
 0x122   : > { %1441 = vmatmul.mubr.msk.bf16.vlgmr.msra.gmra.mrb[8].mxu1 %vm455_vm1, %v773_v37  ;;  %v757_v53 = vpack.c.bf16 %v1859_v50, %v1855_v46  ;;  %v756_v54 = vpack.c.bf16 %v1861_v52, %v1857_v48 }
 0x123   : > { %1444 = vmatprep.mubr.msk.bf16.mxu1 %vm455_vm1, %v774_v40  ;;  %1467 = vmatpush3.bf16.msra.mxu1 %v1025_v27 }
 0x124   : > { %v1434_v56 = vpop.f32.mrb[8].mxu0  ;;  %1472 = vmatprep.subr.bf16.mxu1 %v1619_v2 }
 0x125   : > { %v1869_v58 = vadd.f32 %v1434_v56, %v1325_v44  ;;  %v741_v59 = vpop.f32.mrb[9].mxu0 }
 0x126   : > { %v1871_v61 = vadd.f32 %v1325_v44, %v741_v59  ;;  %v1435_v62 = vpop.f32.mrb[10].mxu0 }
 0x127   : > { %v1873_v0 = vadd.f32 %v1435_v62, %v1325_v44  ;;  %v744_v1 = vpop.f32.mrb[11].mxu0 }
 0x128   : > { %v1875_v3 = vadd.f32 %v1325_v44, %v744_v1 }
 0x129   : > { %v759_v4 = vpack.c.bf16 %v1873_v0, %v1869_v58 }
 0x12a   : > { %1445 = vmatmul.mubr.msk.bf16.gmra.mrb[12].mxu1 %vm455_vm1, %v775_v41  ;;  %v758_v5 = vpack.c.bf16 %v1875_v3, %v1871_v61 }
 0x12b   : > { %1468 = vmatprep.mubr.msk.bf16.mxu1 %vm1620_vm0, %v1619_v2 }
 0x18d   : > { %v867_v42 = vpop.permute.xlu0 %866 }
 0x18e   : > { %v869_v43 = vmul.bf16 %v867_v42, %v563_v38 }
 0x190   : > { %871 = vrot.lane.b32.xlu0 %v869_v43, %s1623_s3  ;;  %s1561_s3 = scalar_lea.vmem %s1560_s17, 32 }
 0x191   : > { %p1563_p1 = scmp.lt.s32.totalorder %s1561_s3, %s1555_s21 }
 0x193   : > { %p1564_p2 = por %p1563_p1, %p1562_p0 }
 0x195   : > { %p1565_p3 = pnand %p1564_p2, %p1558_p13 }
 0x1f5   : > { %v1867_v55 = vpop.f32.mrb[8].mxu1 }
 0x1f6   : > { %v834_v57 = vpop.f32.mrb[9].mxu1  ;;  %v919_v7 = vsel %vm916_vm2, %v1867_v55, -inf }
 0x1f7   : > { %v1443_v60 = vpop.f32.mrb[10].mxu1  ;;  %v917_v10 = vsel %vm916_vm2, %v834_v57, -inf }
 0x1f8   : > { %v837_v63 = vpop.f32.mrb[11].mxu1  ;;  %v920_v14 = vsel %vm916_vm2, %v1443_v60, -inf }
 0x1f9   : > { %v918_v18 = vsel %vm916_vm2, %v837_v63, -inf }
 0x1fd   : > { %v1446_v6 = vpop.f32.mrb[12].mxu1 }
 0x1fe   : > { %v925_v8 = vsel %vm916_vm2, %v1446_v6, -inf  ;;  %v850_v9 = vpop.f32.mrb[13].mxu1 }
 0x1ff   : > { %v926_v11 = vmax.f32 %v919_v7, %v925_v8  ;;  %v921_v12 = vsel %vm916_vm2, %v850_v9, -inf  ;;  %v1447_v13 = vpop.f32.mrb[14].mxu1 }
 0x200   : > { %v922_v15 = vmax.f32 %v917_v10, %v921_v12  ;;  %v927_v16 = vsel %vm916_vm2, %v1447_v13, -inf  ;;  %v853_v17 = vpop.f32.mrb[15].mxu1 }
 0x201   : > { %v928_v19 = vmax.f32 %v920_v14, %v927_v16  ;;  %v923_v20 = vsel %vm916_vm2, %v853_v17, -inf }
 0x202   : > { %v924_v21 = vmax.f32 %v918_v18, %v923_v20  ;;  %v872_v22 = vpop.permute.xlu0 %871 }
 0x203   : > { %v930_v23 = vmax.f32 %v926_v11, %v928_v19  ;;  %1453 = vmatmul.mubr.msk.bf16.vlgmr.msra.gmra.mrb[12].mxu0 %vm455_vm1, %v872_v22 }
 0x204   : > { %v929_v24 = vmax.f32 %v922_v15, %v924_v21  ;;  %1457 = vmatpush3.bf16.msra.mxu0 %v1025_v27 }
 0x206   : > { %v931_v25 = vmax.f32 %v929_v24, %v930_v23 }
 0x208   : > { %v932_v28 = vrot.slane %v931_v25, 4 }
 0x20a   : > { %v933_v29 = vmax.f32 %v931_v25, %v932_v28 }
 0x20c   : > { %v934_v30 = vrot.slane %v933_v29, 2 }
 0x20e   : > { %v935_v31 = vmax.f32 %v933_v29, %v934_v30 }
 0x210   : > { %v936_v32 = vrot.slane %v935_v31, 1 }
 0x212   : > { %v937_v33 = vmax.f32 %v935_v31, %v936_v32 }
 0x2d6   : > { %v910_v35 = vpop.f32.mrb[12].mxu0 }
 0x2d7   : > { %v938_v36 = vmax.f32 %v937_v33, %v910_v35  ;;  %v1454_v37 = vpop.f32.mrb[13].mxu0 }
 0x2d8   : > { %v913_v39 = vpop.f32.mrb[14].mxu0 }
 0x2d9   : > { %v939_v40 = vsub.f32 %v910_v35, %v938_v36  ;;  %v945_v41 = vrot.slane %v938_v36, %v1834_v34  ;;  %v1455_v38 = vpop.f32.mrb[15].mxu0 }
 0x2db   : > { %v946_v42 = vsub.f32 %v834_v57, %v945_v41  ;;  %v947_v43 = vsub.f32 %v837_v63, %v945_v41  ;;  %v948_v44 = vsub.f32 %v1867_v55, %v945_v41  ;;  %v949_v45 = vsub.f32 %v1443_v60, %v945_v41 }
 0x2dc   : > { %v950_v47 = vsub.f32 %v850_v9, %v945_v41  ;;  %v951_v49 = vsub.f32 %v853_v17, %v945_v41  ;;  %v952_v51 = vsub.f32 %v1446_v6, %v945_v41  ;;  %v953_v56 = vsub.f32 %v1447_v13, %v945_v41 }
 0x2dd   : > { %v954_v59 = vmul.f32 1.442695, %v946_v42  ;;  %v956_v62 = vmul.f32 1.442695, %v947_v43  ;;  %v958_v1 = vmul.f32 1.442695, %v948_v44 }
 0x2de   : > { %v960_v7 = vmul.f32 1.442695, %v949_v45  ;;  %v962_v8 = vmul.f32 1.442695, %v950_v47  ;;  %v964_v10 = vmul.f32 1.442695, %v951_v49 }
 0x2df   : > { %1535 = vpow2.f32 %v954_v59  ;;  %v966_v57 = vmul.f32 1.442695, %v952_v51  ;;  %v968_v63 = vmul.f32 1.442695, %v953_v56  ;;  %v940_v28 = vmul.f32 1.442695, %v939_v40 }
 0x2e0   : > { %1537 = vpow2.f32 %v956_v62 }
 0x2e1   : > { %1539 = vpow2.f32 %v958_v1 }
 0x2e2   : > { %1541 = vpow2.f32 %v960_v7 }
 0x2e3   : > { %1543 = vpow2.f32 %v962_v8 }
 0x2e4   : > { %1545 = vpow2.f32 %v964_v10  ;;  %v1533_v10 = vld [vmem:[%s2000_s9] sm:$0xff]  }
 0x2e5   : > { %1547 = vpow2.f32 %v966_v57  ;;  %v1534_v57 = vld [vmem:[%s2000_s9 + $0x8] sm:$0xff]  }
 0x2e6   : > { %1549 = vpow2.f32 %v968_v63 }
 0x2e7   : > { %1551 = vpow2.f32 %v940_v28 }
 0x2e9   : > { %v1536_v55 = vpop.eup %1535 }
 0x2ea   : > { %v1538_v60 = vpop.eup %1537  ;;  %v970_v6 = vsel %vm916_vm2, %v1536_v55, 0.0 }
 0x2eb   : > { %v1540_v9 = vpop.eup %1539  ;;  %v971_v11 = vsel %vm916_vm2, %v1538_v60, 0.0 }
 0x2ec   : > { %v1542_v12 = vpop.eup %1541  ;;  %v972_v13 = vadd.f32 %v971_v11, %v970_v6  ;;  %v973_v14 = vsel %vm916_vm2, %v1540_v9, 0.0 }
 0x2ed   : > { %v1544_v15 = vpop.eup %1543  ;;  %v975_v17 = vsel %vm916_vm2, %v1542_v12, 0.0 }
 0x2ee   : > { %v974_v16 = vadd.f32 %v973_v14, %v972_v13  ;;  %v1546_v18 = vpop.eup %1545  ;;  %v977_v20 = vsel %vm916_vm2, %v1544_v15, 0.0 }
 0x2ef   : > { %v1548_v21 = vpop.eup %1547  ;;  %v979_v23 = vsel %vm916_vm2, %v1546_v18, 0.0 }
 0x2f0   : > { %v976_v19 = vadd.f32 %v975_v17, %v974_v16  ;;  %v1550_v24 = vpop.eup %1549  ;;  %v981_v26 = vsel %vm916_vm2, %v1548_v21, 0.0 }
 0x2f1   : > { %v983_v29 = vsel %vm916_vm2, %v1550_v24, 0.0  ;;  %v1552_v39 = vpop.eup %1551 }
 0x2f2   : > { %v978_v22 = vadd.f32 %v977_v20, %v976_v19 }
 0x2f4   : > { %v980_v25 = vadd.f32 %v979_v23, %v978_v22 }
 0x2f6   : > { %v982_v27 = vadd.f32 %v981_v26, %v980_v25 }
 0x2f8   : > { %v984_v30 = vadd.f32 %v983_v29, %v982_v27 }
 0x2fa   : > { %v985_v31 = vrot.slane %v984_v30, 4 }
 0x2fc   : > { %v986_v32 = vadd.f32 %v985_v31, %v984_v30 }
 0x2fe   : > { %v987_v33 = vrot.slane %v986_v32, 2 }
 0x300   : > { %v988_v35 = vadd.f32 %v987_v33, %v986_v32 }
 0x302   : > { %v989_v36 = vrot.slane %v988_v35, 1 }
 0x304   : > { %v990_v37 = vadd.f32 %v989_v36, %v988_v35 }
 0x306   : > { %v991_v41 = vadd.f32 %v1552_v39, %v990_v37 }
 0x308   : > { %1553 = vrcp.f32 %v991_v41 }
 0x312   : > { %v1554_v38 = vpop.eup %1553 }
 0x313   : > { %v996_v42 = vrot.slane %v1554_v38, %v1834_v34  ;;  %v1009_v43 = vmul.f32 %v1554_v38, %v1552_v39 }
 0x315   : > { %v1010_v44 = vpack.c.bf16 %v1009_v43, %v1009_v43  ;;  %v997_v45 = vmul.f32 %v1536_v55, %v996_v42  ;;  %v998_v40 = vmul.f32 %v1538_v60, %v996_v42  ;;  %v999_v47 = vmul.f32 %v1540_v9, %v996_v42  ;;  %v1174_v43 = vpop.permute.xlu1 %1173 }
 0x316   : > { %v1000_v49 = vmul.f32 %v1542_v12, %v996_v42  ;;  %v1001_v51 = vmul.f32 %v1544_v15, %v996_v42  ;;  %v1002_v56 = vmul.f32 %v1546_v18, %v996_v42  ;;  %v1003_v59 = vmul.f32 %v1548_v21, %v996_v42 }
 0x317   : > { %1469 = vmatmul.mubr.msk.bf16.vlgmr.msra.gmra.mrb[16].mxu1 %vm916_vm2, %v1010_v44  ;;  %v1005_v62 = vpack.c.bf16 %v998_v40, %v997_v45  ;;  %v1004_v1 = vmul.f32 %v1550_v24, %v996_v42 }
 0x318   : > { %v1006_v7 = vpack.c.bf16 %v1000_v49, %v999_v47  ;;  %v1007_v8 = vpack.c.bf16 %v1002_v56, %v1001_v51  ;;  %1476 = vmatprep.mubr.msk.bf16.mxu1 %vm1620_vm0, %v1619_v2  ;;  %1473 = vmatpush3.bf16.msra.mxu1 %v1533_v10  ;;  %v1183_v49 = vld [vmem:[%s2001_s10] sm:$0x1] }
 0x319   : > { %1458 = vmatprep.mubr.msk.bf16.mxu0 %vm916_vm2, %v1005_v62  ;;  %v1008_v34 = vpack.c.bf16 %v1004_v1, %v1003_v59  ;;  %1474 = vmatprep.subr.bf16.mxu1 %v1619_v2 }
 0x31a   : > { %1459 = vmatmul.mubr.msk.bf16.vlgmr.msra.gmra.mrb[16].mxu0 %vm916_vm2, %v1006_v7 }
 0x31b   : > { %1462 = vmatprep.mubr.msk.bf16.mxu0 %vm916_vm2, %v1007_v8 }
 0x31c   : > { %1475 = vmatpush3.bf16.msra.mxu1 %v1534_v57 }
 0x322   : > { %1463 = vmatmul.mubr.msk.bf16.gmra.mrb[20].mxu0 %vm916_vm2, %v1008_v34 }
 0x3ea   : > { %v1133_v63 = vpop.f32.mrb[16].mxu1 }
 0x3eb   : > { %v1470_v55 = vpop.f32.mrb[17].mxu1  ;;  %v1176_v44 = vmul.f32 %v1174_v43, %v1133_v63 }
 0x3ec   : > { %v1136_v60 = vpop.f32.mrb[18].mxu1 }
 0x3ed   : > { %v1460_v6 = vpop.f32.mrb[16].mxu0  ;;  %v1471_v9 = vpop.f32.mrb[19].mxu1 }
 0x3ee   : > { %v1061_v11 = vpop.f32.mrb[17].mxu0 }
 0x3ef   : > { %v1461_v12 = vpop.f32.mrb[18].mxu0 }
 0x3f0   : > { %v1093_v13 = vpack.c.bf16 %v1461_v12, %v1460_v6  ;;  %v1064_v14 = vpop.f32.mrb[19].mxu0 }
 0x3f1   : > { %v1092_v15 = vpack.c.bf16 %v1064_v14, %v1061_v11 }
 0x3f2   : > { %v1140_v16 = vmul.bf16 %v1093_v13, %v757_v53 }
 0x3f3   : > { %v1139_v17 = vmul.bf16 %v1092_v15, %v756_v54 }
 0x3f4   : > { %v1145_v2 = vunpack.c.l.bf16 %v1140_v16  ;;  %v1146_v22 = vunpack.c.h.bf16 %v1140_v16 }
 0x3f5   : > { %v1143_v18 = vunpack.c.l.bf16 %v1139_v17  ;;  %v1144_v19 = vunpack.c.h.bf16 %v1139_v17  ;;  %v1464_v20 = vpop.f32.mrb[20].mxu0 }
 0x3f6   : > { %v1077_v21 = vpop.f32.mrb[21].mxu0  ;;  %v1154_v46 = vsel %vm455_vm1, %v1145_v2, 0.0  ;;  %v1156_v52 = vsel %vm455_vm1, %v1146_v22, 0.0 }
 0x3f7   : > { %v1151_v23 = vsel %vm455_vm1, %v1143_v18, 0.0  ;;  %v1152_v24 = vsel %vm455_vm1, %v1144_v19, 0.0  ;;  %v1465_v25 = vpop.f32.mrb[22].mxu0 }
 0x3f8   : > { %v1153_v26 = vadd.f32 %v1152_v24, %v1151_v23  ;;  %v1095_v27 = vpack.c.bf16 %v1465_v25, %v1464_v20  ;;  %v1080_v28 = vpop.f32.mrb[23].mxu0 }
 0x3f9   : > { %v1094_v50 = vpack.c.bf16 %v1080_v28, %v1077_v21 }
 0x3fa   : > { %v1155_v53 = vadd.f32 %v1154_v46, %v1153_v26  ;;  %v1142_v48 = vmul.bf16 %v1095_v27, %v759_v4 }
 0x3fb   : > { %v1141_v54 = vmul.bf16 %v1094_v50, %v758_v5 }
 0x3fc   : > { %v1157_v29 = vadd.f32 %v1156_v52, %v1155_v53  ;;  %v1149_v32 = vunpack.c.l.bf16 %v1142_v48  ;;  %v1150_v36 = vunpack.c.h.bf16 %v1142_v48 }
 0x3fd   : > { %v1147_v30 = vunpack.c.l.bf16 %v1141_v54  ;;  %v1148_v31 = vunpack.c.h.bf16 %v1141_v54 }
 0x3fe   : > { %v1162_v58 = vsel %vm455_vm1, %v1149_v32, 0.0  ;;  %v1164_v4 = vsel %vm455_vm1, %v1150_v36, 0.0 }
 0x3ff   : > { %v1158_v33 = vsel %vm455_vm1, %v1147_v30, 0.0  ;;  %v1160_v37 = vsel %vm455_vm1, %v1148_v31, 0.0 }
 0x400   : > { %v1159_v35 = vadd.f32 %v1158_v33, %v1157_v29 }
 0x402   : > { %v1161_v39 = vadd.f32 %v1160_v37, %v1159_v35 }
 0x404   : > { %v1163_v0 = vadd.f32 %v1162_v58, %v1161_v39 }
 0x406   : > { %v1165_v61 = vadd.f32 %v1164_v4, %v1163_v0 }
 0x408   : > { %v1166_v3 = vrot.slane %v1165_v61, 4 }
 0x40a   : > { %v1167_v5 = vadd.f32 %v1166_v3, %v1165_v61 }
 0x40c   : > { %v1168_v41 = vrot.slane %v1167_v5, 2 }
 0x40e   : > { %v1169_v38 = vadd.f32 %v1168_v41, %v1167_v5 }
 0x410   : > { %v1170_v42 = vrot.slane %v1169_v38, 1 }
 0x412   : > { %v1171_v45 = vadd.f32 %v1170_v42, %v1169_v38 }
 0x414   : > { %v1177_v40 = vadd.f32 %v1176_v44, %v1171_v45 }
 0x416   : > { %v1178_v47 = vpack.c.bf16 %v1177_v40, %v1177_v40 }
 0x418   : > { %1477 = vmatmul.mubr.msk.bf16.vlgmr.msra.gmra.mrb[20].mxu1 %vm455_vm1, %v1178_v47 }
 0x4eb   : > { %v1233_v51 = vpop.f32.mrb[20].mxu1 }
 0x4ec   : > { %v1234_v56 = vadd.f32 %v1233_v51, %v1183_v49  ;;  %v1478_v59 = vpop.f32.mrb[21].mxu1 }
 0x4ed   : > { %v1236_v62 = vpop.f32.mrb[22].mxu1 }
 0x4ee   : > { %v1479_v1 = vpop.f32.mrb[23].mxu1  ;;  %1240 = vst.msk [vmem:[%s432_s23] sm:$0x1] %vm1239_vm4, %v1234_v56 }
 0x4ef   : > { %1568 = shalt.err (!%p1565_p3)
}
 0x4f0   : > { %s1569_s5 = scalar_lea.hbm %s1949_s20, 16  ;;  %s1573_s30 = scalar_lea.hbm %s2004_s13, 32 }
 0x4f1   : > { %p1570_p4 = scmp.ne.s32.totalorder %s1949_s20, %s1569_s5  ;;  %p1574_p9 = scmp.lt.u32.totalorder %s1949_s20, %s2004_s13 }
 0x4f2   : > { %p1575_p10 = scmp.lt.u32.totalorder %s1573_s30, %s1569_s5  ;;  %p1577_p12 = scmp.lt.u32.totalorder %s1569_s5, %s1949_s20 }
 0x4f3   : > { %p1571_p7 = pnand %p1570_p4, %p1733_p5 }
 0x4f4   : > { %p1576_p11 = por %p1575_p10, %p1574_p9 }
 0x4f5   : > { %p1572_p8 = pneg %p1571_p7 }
 0x4f6   : > { %p1578_p13 = por %p1577_p12, %p1576_p11 }
 0x4f8   : > { %p1579_p0 = pnand %p1578_p13, %p1572_p8 }
 0x4fa   : > { %1582 = shalt.err (!%p1579_p0)
}
 0x4fb   : > { %1481 = dma.vmem_to_hbm [thread:$0]  (%p1733_p5), %s1951_s24, 16, %s1949_s20, %s1242_s29  }
 0x4fc PF: > { %p1487_p1 = scmp.ge.s32.totalorder %s1617_s28, 2  ;;  %s1266_s21 = sand.u32 1, %s1605_s25  }
 0x4fd   : > { %s1267_s17 = scalar_lea.sflag [#allocation3], %s1266_s21 }
 0x4fe   : > { %p1484_p2 = pnand %p1487_p1, %p1737_p6 }
 0x500   : > { %1600 = dma.done.wait (!%p1484_p2), %s1267_s17, 16  }
 0x501   : > { %1602 = vsyncadd (!%p1484_p2), %s1267_s17, 4294967280  ;;  %s2012_s3 = sld [smem:[#allocation5_spill]]  ;;  %p23_p3 = scmp.ge.s32.totalorder %s1720_s14, 4  }
 0x502   : > { %s2013_s25 = smov %s1609_s26  ;;  %s2014_s26 = smov %s1613_s27 }
 0x503   : > { %s2016_s28 = smov %s1720_s14  ;;  %25 = sbr.rel (!%p23_p3) target bundleno = 6 (0x6), region = 107 }
 0x507   : > { %s2015_s27 = smov %s2012_s3 }
 0x50a   :  { %1271 = vsyncpa [#allocation3], 1 }
 0x50b   :  { %1273 = vsyncpa [#allocation3 + $0x1], 1 }

</bundles_post_ra>
